<compile_context>
chip_gen: v7x
topology: tpu7x:2x2x1
jax: 0.10.0
libtpu: 0.0.40
codegen_flags: <defaults>
</compile_context>

<pallas_src>
import functools

import jax
import jax.numpy as jnp
from jax.experimental import pallas as pl
from jax.experimental.pallas import tpu as pltpu

_LANE = 128
_CHUNK = 512  # rows per in-kernel sub-chunk (bounds unrolled code size)


def _round_up(x, m):
    return ((x + m - 1) // m) * m


def _num_tensorcores():
    """Best-effort TensorCores-per-chip (2 on v7x, 1 on v5e/v6e)."""
    try:
        info = pltpu.get_tpu_info()
    except Exception:
        return 1
    for name in ("num_tensorcores", "tensorcores_per_chip", "tensorcore_count",
                 "num_cores_per_chip", "cores_per_chip"):
        v = getattr(info, name, None)
        if isinstance(v, int) and 1 <= v <= 8:
            return v
    return 1


def _ghmc_kernel(pred_ref, target_ref, cnt_out_ref, bce_out_ref,
                 cnt_acc, bce_acc, *, edges, tm, ck, rows, steps, mask_tail):
    """Accumulate cumulative per-edge (count, bce_sum) partials.

    pred_ref/target_ref: (tm, 128) tile of the flattened inputs (possibly partial).
    cnt_out_ref/bce_out_ref: (EDGE_ROWS, 128) per-core outputs, written once.
    cnt_acc/bce_acc: (EDGE_ROWS, 8, 128) VMEM scratch accumulators.
    Row i holds sum over seen elements of [g >= edges[i]] (and * bce), so
    per-bin values are adjacent differences (done in the tiny wrapper epilogue).
    """
    c = pl.program_id(0)
    s = pl.program_id(1)

    @pl.when(s == 0)
    def _init():
        cnt_acc[...] = jnp.zeros_like(cnt_acc)
        bce_acc[...] = jnp.zeros_like(bce_acc)

    block_row0 = (c * steps + s) * tm
    nchunks = tm // ck

    def accumulate(p, t, valid):
        p = p.astype(jnp.float32)
        t = t.astype(jnp.float32)
        if valid is not None:
            # pad pattern: g = 2 > every edge -> appears in every cumulative
            # row and cancels out of every per-bin difference.
            p = jnp.where(valid, p, 2.0)
            t = jnp.where(valid, t, 0.0)
        g = jnp.abs(p - t)
        # stable binary_cross_entropy_with_logits: max(x,0) - x*t + log1p(exp(-|x|))
        bce = jnp.maximum(p, 0.0) - p * t + jnp.log1p(jnp.exp(-jnp.abs(p)))
        if valid is not None:
            bce = jnp.where(valid, bce, 0.0)  # keep pad bce out of the f32 sums
        g3 = g.reshape(ck // 8, 8, _LANE)
        b3 = bce.reshape(ck // 8, 8, _LANE)
        for i, e in enumerate(edges):
            if i == 0:
                # edge 0 (e == 0.0): mask is identically 1 -> constant count.
                cnt_acc[0] += ck // 8
                bce_acc[0] += jnp.sum(b3, axis=0)
            else:
                m = g3 >= e
                cnt_acc[i] += jnp.sum(m.astype(jnp.int32), axis=0)
                bce_acc[i] += jnp.sum(jnp.where(m, b3, 0.0), axis=0)

    def chunk(j, carry):
        off = pl.multiple_of(j * ck, 8)
        p = pred_ref[pl.ds(off, ck), :]
        t = target_ref[pl.ds(off, ck), :]
        row0 = block_row0 + j * ck
        if mask_tail:
            # mask only the ragged tail chunk(s); full chunks take the cheap path
            @pl.when(row0 + ck <= rows)
            def _full():
                accumulate(p, t, None)

            @pl.when(row0 + ck > rows)
            def _ragged():
                ridx = jax.lax.broadcasted_iota(jnp.int32, (ck, _LANE), 0) + row0
                accumulate(p, t, ridx < rows)
        else:
            accumulate(p, t, None)
        return carry

    jax.lax.fori_loop(0, nchunks, chunk, 0)

    # final step: fold sublanes + lanes (XLU has slack) so the wrapper epilogue
    # is pure O(bins) scalar math.
    @pl.when(s == steps - 1)
    def _flush():
        cnt_out_ref[...] = jnp.zeros_like(cnt_out_ref)
        bce_out_ref[...] = jnp.zeros_like(bce_out_ref)
        for i in range(len(edges)):
            c_row = jnp.sum(cnt_acc[i], axis=0, keepdims=True)     # (1,128)
            b_row = jnp.sum(bce_acc[i], axis=0, keepdims=True)
            c_tot = jnp.sum(c_row, axis=1, keepdims=True)          # (1,1)
            b_tot = jnp.sum(b_row, axis=1, keepdims=True)
            cnt_out_ref[i:i + 1, :] = jnp.broadcast_to(c_tot, (1, _LANE))
            bce_out_ref[i:i + 1, :] = jnp.broadcast_to(b_tot, (1, _LANE))


@functools.partial(jax.jit, static_argnames=("bins", "ncores", "core_parallel"))
def _ghmc_impl(pred, target, *, bins, ncores, core_parallel):
    n_elem = int(pred.size)
    if n_elem == 0:
        return jnp.float32(0.0)

    # `edges` buffer from __init__ (deterministic, shape [bins+1])
    edges = [i / bins for i in range(bins + 1)]
    edges[-1] = edges[-1] + 1e-6
    edge_rows = _round_up(bins + 1, 8)

    # ---- lane-dense [rows, 128] view of the flattened inputs ----
    # free reshape when numel % 128 == 0; ragged grid tail is masked in-kernel.
    flat_p = jnp.ravel(pred)
    flat_t = jnp.ravel(target)
    rem = (-n_elem) % _LANE
    if rem:
        # TODO(synk): only when numel % 128 != 0 a (<128-element) pad still costs
        # one copy; everything else is handled by in-kernel masking.
        flat_p = jnp.pad(flat_p, (0, rem), constant_values=2.0)
        flat_t = jnp.pad(flat_t, (0, rem), constant_values=0.0)
    rows = (n_elem + rem) // _LANE
    pred2d = flat_p.reshape(rows, _LANE)
    targ2d = flat_t.reshape(rows, _LANE)

    itemsize = max(pred2d.dtype.itemsize, targ2d.dtype.itemsize)
    cap = 2048 if itemsize >= 4 else 4096
    if rows <= _CHUNK:
        tm = _round_up(rows, 8)
        ck = tm
    else:
        tm = min(cap, _round_up(rows, _CHUNK))
        ck = _CHUNK
    nblocks = pl.cdiv(rows, tm)
    if nblocks < ncores:
        ncores = 1
    core_parallel = bool(core_parallel and ncores > 1)
    steps = pl.cdiv(nblocks, ncores)
    mask_tail = (ncores * steps * tm != rows)

    def _in_map(c, s):
        # clamp so over-scheduled blocks (multi-core tail) stay in bounds; their
        # contribution is fully masked to the pad pattern in-kernel.
        return (jnp.minimum(c * steps + s, nblocks - 1), 0)

    kernel = functools.partial(
        _ghmc_kernel, edges=tuple(edges), tm=tm, ck=ck, rows=rows,
        steps=steps, mask_tail=mask_tail)

    n_sched = ncores * steps * tm * _LANE
    cost = pl.CostEstimate(
        flops=int(n_sched * (12 + 5 * bins)),
        transcendentals=int(2 * n_sched),
        bytes_accessed=int(n_sched * (pred2d.dtype.itemsize + targ2d.dtype.itemsize)
                           + 2 * ncores * edge_rows * _LANE * 4),
    )

    if core_parallel:
        dim_sem = (pltpu.CORE_PARALLEL, pltpu.ARBITRARY)
    else:
        dim_sem = ("arbitrary", "arbitrary")

    cnt, bce = pl.pallas_call(
        kernel,
        out_shape=(jax.ShapeDtypeStruct((ncores, edge_rows, _LANE), jnp.int32),
                   jax.ShapeDtypeStruct((ncores, edge_rows, _LANE), jnp.float32)),
        grid_spec=pltpu.PrefetchScalarGridSpec(
            num_scalar_prefetch=0,
            grid=(ncores, steps),
            in_specs=[
                pl.BlockSpec((tm, _LANE), _in_map),
                pl.BlockSpec((tm, _LANE), _in_map),
            ],
            out_specs=[
                pl.BlockSpec((None, edge_rows, _LANE), lambda c, s: (c, 0, 0)),
                pl.BlockSpec((None, edge_rows, _LANE), lambda c, s: (c, 0, 0)),
            ],
            scratch_shapes=[
                pltpu.VMEM((edge_rows, 8, _LANE), jnp.int32),
                pltpu.VMEM((edge_rows, 8, _LANE), jnp.float32),
            ],
        ),
        compiler_params=pltpu.CompilerParams(dimension_semantics=dim_sem),
        cost_estimate=cost,
    )(pred2d, targ2d)

    # ---- O(bins) scalar epilogue: per-bin = adjacent cumulative differences ----
    cum_cnt = jnp.sum(cnt[:, :bins + 1, 0], axis=0)   # int32, exact counts
    cum_bce = jnp.sum(bce[:, :bins + 1, 0], axis=0)
    count_b = cum_cnt[:-1] - cum_cnt[1:]              # per-bin element count
    bce_b = cum_bce[:-1] - cum_bce[1:]                # per-bin BCE sum
    nonempty = count_b > 0
    n = jnp.sum(nonempty.astype(jnp.float32))         # number of non-empty bins
    per_bin = jnp.where(nonempty,
                        bce_b / jnp.maximum(count_b, 1).astype(jnp.float32),
                        0.0)
    loss = jnp.where(n > 0,
                     jnp.sum(per_bin) / jnp.maximum(n, 1.0),
                     jnp.float32(0.0))
    return loss


def ghmc_loss(pred, target, bins=10):
    """pred, target: float arrays of shape [batch_num, class_num] (same shape)."""
    assert pred.shape == target.shape
    ncores = _num_tensorcores()
    if ncores > 1:
        try:
            out = _ghmc_impl(pred, target, bins=bins, ncores=ncores,
                             core_parallel=True)
            return jax.block_until_ready(out)
        except Exception:
            # CORE_PARALLEL not supported on this chip/toolchain -> single core.
            pass
    return _ghmc_impl(pred, target, bins=bins, ncores=1, core_parallel=False)


def _ghmc_reference(pred, target, bins=10):
    """Pure-JAX mirror of the PyTorch forward (for a correctness check)."""
    pred = pred.astype(jnp.float32)
    target = target.astype(jnp.float32)
    edges = [i / bins for i in range(bins + 1)]
    edges[-1] = edges[-1] + 1e-6
    g = jnp.abs(pred - target)
    tot = max(float(pred.size), 1.0)
    weights = jnp.zeros_like(pred)
    n = jnp.float32(0.0)
    for i in range(bins):
        inds = (g >= edges[i]) & (g < edges[i + 1])
        num = jnp.sum(inds.astype(jnp.float32))
        nonempty = num > 0
        w = jnp.where(nonempty, tot / jnp.maximum(num, 1.0), 0.0)
        weights = weights + jnp.where(inds, w, 0.0)
        n = n + jnp.where(nonempty, 1.0, 0.0)
    weights = jnp.where(n > 0, weights / jnp.maximum(n, 1.0), weights)
    bce = jnp.maximum(pred, 0.0) - pred * target + jnp.log1p(jnp.exp(-jnp.abs(pred)))
    return jnp.sum(weights * bce) / tot


if __name__ == "__main__":
    key = jax.random.PRNGKey(0)
    k1, k2 = jax.random.split(key)

    batch_num, class_num = 8, 32
    pred = jax.random.normal(k1, (batch_num, class_num), dtype=jnp.float32)
    target = (jax.random.uniform(k2, (batch_num, class_num)) > 0.5).astype(jnp.float32)

    loss = ghmc_loss(pred, target, bins=10)
    jax.block_until_ready(loss)

    ref = _ghmc_reference(pred, target, bins=10)
    jax.block_until_ready(ref)
    assert abs(float(loss) - float(ref)) <= 1e-5 + 1e-3 * abs(float(ref)), (
        f"mismatch: kernel={float(loss)} ref={float(ref)}")

    print("KERNEL_OK")
</pallas_src>

<mosaic_0001>
module attributes {stable_mosaic.version = 11 : i64} {
  func.func @_ghmc_kernel(%arg0: i32, %arg1: i32, %arg2: memref<8x128xf32, #tpu.memory_space<vmem>>, %arg3: memref<8x128xf32, #tpu.memory_space<vmem>>, %arg4: memref<1x16x128xi32, #tpu.memory_space<vmem>>, %arg5: memref<1x16x128xf32, #tpu.memory_space<vmem>>, %arg6: memref<16x8x128xi32, #tpu.memory_space<vmem>>, %arg7: memref<16x8x128xf32, #tpu.memory_space<vmem>>) attributes {dimension_semantics = [#tpu.dimension_semantics<arbitrary>, #tpu.dimension_semantics<arbitrary>], iteration_bounds = array<i64: 1, 1>, scalar_prefetch = 0 : i64, scratch_operands = 2 : i64, tpu.core_type = #tpu.core_type<tc>, window_params = [{transform_indices = @transform_0, window_bounds = array<i64: 8, 128>}, {transform_indices = @transform_1, window_bounds = array<i64: 8, 128>}, {transform_indices = @transform_2, window_bounds = array<i64: 1, 16, 128>}, {transform_indices = @transform_3, window_bounds = array<i64: 1, 16, 128>}]} {
    %c0_i32 = arith.constant 0 : i32
    %0 = arith.cmpi eq, %arg1, %c0_i32 : i32
    %1 = arith.extui %0 : i1 to i32
    %c0_i32_0 = arith.constant 0 : i32
    %2 = arith.cmpi ne, %1, %c0_i32_0 : i32
    scf.if %2 {
      %c0_i32_13 = arith.constant 0 : i32
      %25 = vector.broadcast %c0_i32_13 : i32 to vector<16x8x128xi32>
      %c0_14 = arith.constant 0 : index
      %c0_15 = arith.constant 0 : index
      %c0_16 = arith.constant 0 : index
      %26 = vector.load %arg6[%c0_14, %c0_15, %c0_16] : memref<16x8x128xi32, #tpu.memory_space<vmem>>, vector<16x8x128xi32>
      tpu.vector_store %arg6[%c0_14, %c0_15, %c0_16], %25 {strides = array<i32>} : memref<16x8x128xi32, #tpu.memory_space<vmem>>, vector<16x8x128xi32>,
      %cst = arith.constant 0.000000e+00 : f32
      %27 = vector.broadcast %cst : f32 to vector<16x8x128xf32>
      %c0_17 = arith.constant 0 : index
      %c0_18 = arith.constant 0 : index
      %c0_19 = arith.constant 0 : index
      %28 = vector.load %arg7[%c0_17, %c0_18, %c0_19] : memref<16x8x128xf32, #tpu.memory_space<vmem>>, vector<16x8x128xf32>
      tpu.vector_store %arg7[%c0_17, %c0_18, %c0_19], %27 {strides = array<i32>} : memref<16x8x128xf32, #tpu.memory_space<vmem>>, vector<16x8x128xf32>,
    } else {
    }
    %c1_i32 = arith.constant 1 : i32
    %3 = arith.muli %arg0, %c1_i32 : i32
    %4 = arith.addi %3, %arg1 : i32
    %c8_i32 = arith.constant 8 : i32
    %5 = arith.muli %4, %c8_i32 : i32
    %c0_i32_1 = arith.constant 0 : i32
    %c8_i32_2 = arith.constant 8 : i32
    %6 = arith.muli %c0_i32_1, %c8_i32_2 : i32
    %7 = tpu.assume_multiple %6, 8 : i32
    %8 = arith.index_cast %7 : i32 to index
    %c0 = arith.constant 0 : index
    %9 = vector.load %arg2[%8, %c0] : memref<8x128xf32, #tpu.memory_space<vmem>>, vector<8x128xf32>
    %10 = arith.index_cast %7 : i32 to index
    %c0_3 = arith.constant 0 : index
    %11 = vector.load %arg3[%10, %c0_3] : memref<8x128xf32, #tpu.memory_space<vmem>>, vector<8x128xf32>
    %c8_i32_4 = arith.constant 8 : i32
    %12 = arith.muli %c0_i32_1, %c8_i32_4 : i32
    %13 = arith.addi %5, %12 : i32
    %c8_i32_5 = arith.constant 8 : i32
    %14 = arith.addi %13, %c8_i32_5 : i32
    %c2_i32 = arith.constant 2 : i32
    %15 = arith.cmpi sle, %14, %c2_i32 : i32
    %16 = arith.extui %15 : i1 to i32
    %c0_i32_6 = arith.constant 0 : i32
    %17 = arith.cmpi ne, %16, %c0_i32_6 : i32
    scf.if %17 {
      %25 = arith.subf %9, %11 : vector<8x128xf32>
      %26 = math.absf %25 : vector<8x128xf32>
      %cst = arith.constant 0.000000e+00 : f32
      %27 = vector.broadcast %cst : f32 to vector<8x128xf32>
      %28 = arith.maximumf %9, %27 : vector<8x128xf32>
      %29 = arith.mulf %9, %11 : vector<8x128xf32>
      %30 = arith.subf %28, %29 : vector<8x128xf32>
      %31 = math.absf %9 : vector<8x128xf32>
      %cst_13 = arith.constant 0.000000e+00 : f32
      %32 = vector.broadcast %cst_13 : f32 to vector<8x128xf32>
      %33 = arith.subf %32, %31 : vector<8x128xf32>
      %34 = math.exp %33 : vector<8x128xf32>
      %35 = math.log1p %34 : vector<8x128xf32>
      %36 = arith.addf %30, %35 : vector<8x128xf32>
      %37 = vector.shape_cast %26 : vector<8x128xf32> to vector<1x8x128xf32>
      %38 = vector.shape_cast %36 : vector<8x128xf32> to vector<1x8x128xf32>
      %c0_14 = arith.constant 0 : index
      %c0_15 = arith.constant 0 : index
      %c0_16 = arith.constant 0 : index
      %39 = vector.load %arg6[%c0_14, %c0_15, %c0_16] : memref<16x8x128xi32, #tpu.memory_space<vmem>>, vector<1x8x128xi32>
      %40 = vector.shape_cast %39 : vector<1x8x128xi32> to vector<8x128xi32>
      %c1_i32_17 = arith.constant 1 : i32
      %41 = vector.broadcast %c1_i32_17 : i32 to vector<8x128xi32>
      %42 = arith.addi %40, %41 : vector<8x128xi32>
      %c0_18 = arith.constant 0 : index
      %c0_19 = arith.constant 0 : index
      %c0_20 = arith.constant 0 : index
      %43 = vector.load %arg6[%c0_18, %c0_19, %c0_20] : memref<16x8x128xi32, #tpu.memory_space<vmem>>, vector<1x8x128xi32>
      %44 = vector.shape_cast %43 : vector<1x8x128xi32> to vector<8x128xi32>
      %45 = vector.shape_cast %42 : vector<8x128xi32> to vector<1x8x128xi32>
      tpu.vector_store %arg6[%c0_18, %c0_19, %c0_20], %45 {strides = array<i32>} : memref<16x8x128xi32, #tpu.memory_space<vmem>>, vector<1x8x128xi32>,
      %c0_21 = arith.constant 0 : index
      %c0_22 = arith.constant 0 : index
      %c0_23 = arith.constant 0 : index
      %46 = vector.load %arg7[%c0_21, %c0_22, %c0_23] : memref<16x8x128xf32, #tpu.memory_space<vmem>>, vector<1x8x128xf32>
      %47 = vector.shape_cast %46 : vector<1x8x128xf32> to vector<8x128xf32>
      %cst_24 = arith.constant dense<0.000000e+00> : vector<8x128xf32>
      %48 = vector.multi_reduction <add>, %38, %cst_24 [0] : vector<1x8x128xf32> to vector<8x128xf32>
      %49 = arith.addf %47, %48 : vector<8x128xf32>
      %c0_25 = arith.constant 0 : index
      %c0_26 = arith.constant 0 : index
      %c0_27 = arith.constant 0 : index
      %50 = vector.load %arg7[%c0_25, %c0_26, %c0_27] : memref<16x8x128xf32, #tpu.memory_space<vmem>>, vector<1x8x128xf32>
      %51 = vector.shape_cast %50 : vector<1x8x128xf32> to vector<8x128xf32>
      %52 = vector.shape_cast %49 : vector<8x128xf32> to vector<1x8x128xf32>
      tpu.vector_store %arg7[%c0_25, %c0_26, %c0_27], %52 {strides = array<i32>} : memref<16x8x128xf32, #tpu.memory_space<vmem>>, vector<1x8x128xf32>,
      %cst_28 = arith.constant 1.000000e-01 : f32
      %53 = vector.broadcast %cst_28 : f32 to vector<1x8x128xf32>
      %54 = arith.cmpf oge, %37, %53 : vector<1x8x128xf32>
      %c1 = arith.constant 1 : index
      %c0_29 = arith.constant 0 : index
      %c0_30 = arith.constant 0 : index
      %55 = vector.load %arg6[%c1, %c0_29, %c0_30] : memref<16x8x128xi32, #tpu.memory_space<vmem>>, vector<1x8x128xi32>
      %56 = vector.shape_cast %55 : vector<1x8x128xi32> to vector<8x128xi32>
      %57 = arith.extui %54 : vector<1x8x128xi1> to vector<1x8x128xi32>
      %cst_31 = arith.constant dense<0> : vector<8x128xi32>
      %58 = vector.multi_reduction <add>, %57, %cst_31 [0] : vector<1x8x128xi32> to vector<8x128xi32>
      %59 = arith.addi %56, %58 : vector<8x128xi32>
      %c1_32 = arith.constant 1 : index
      %c0_33 = arith.constant 0 : index
      %c0_34 = arith.constant 0 : index
      %60 = vector.load %arg6[%c1_32, %c0_33, %c0_34] : memref<16x8x128xi32, #tpu.memory_space<vmem>>, vector<1x8x128xi32>
      %61 = vector.shape_cast %60 : vector<1x8x128xi32> to vector<8x128xi32>
      %62 = vector.shape_cast %59 : vector<8x128xi32> to vector<1x8x128xi32>
      tpu.vector_store %arg6[%c1_32, %c0_33, %c0_34], %62 {strides = array<i32>} : memref<16x8x128xi32, #tpu.memory_space<vmem>>, vector<1x8x128xi32>,
      %c1_35 = arith.constant 1 : index
      %c0_36 = arith.constant 0 : index
      %c0_37 = arith.constant 0 : index
      %63 = vector.load %arg7[%c1_35, %c0_36, %c0_37] : memref<16x8x128xf32, #tpu.memory_space<vmem>>, vector<1x8x128xf32>
      %64 = vector.shape_cast %63 : vector<1x8x128xf32> to vector<8x128xf32>
      %cst_38 = arith.constant 0.000000e+00 : f32
      %65 = vector.broadcast %cst_38 : f32 to vector<1x8x128xf32>
      %66 = arith.select %54, %38, %65 : vector<1x8x128xi1>, vector<1x8x128xf32>
      %cst_39 = arith.constant dense<0.000000e+00> : vector<8x128xf32>
      %67 = vector.multi_reduction <add>, %66, %cst_39 [0] : vector<1x8x128xf32> to vector<8x128xf32>
      %68 = arith.addf %64, %67 : vector<8x128xf32>
      %c1_40 = arith.constant 1 : index
      %c0_41 = arith.constant 0 : index
      %c0_42 = arith.constant 0 : index
      %69 = vector.load %arg7[%c1_40, %c0_41, %c0_42] : memref<16x8x128xf32, #tpu.memory_space<vmem>>, vector<1x8x128xf32>
      %70 = vector.shape_cast %69 : vector<1x8x128xf32> to vector<8x128xf32>
      %71 = vector.shape_cast %68 : vector<8x128xf32> to vector<1x8x128xf32>
      tpu.vector_store %arg7[%c1_40, %c0_41, %c0_42], %71 {strides = array<i32>} : memref<16x8x128xf32, #tpu.memory_space<vmem>>, vector<1x8x128xf32>,
      %cst_43 = arith.constant 2.000000e-01 : f32
      %72 = vector.broadcast %cst_43 : f32 to vector<1x8x128xf32>
      %73 = arith.cmpf oge, %37, %72 : vector<1x8x128xf32>
      %c2 = arith.constant 2 : index
      %c0_44 = arith.constant 0 : index
      %c0_45 = arith.constant 0 : index
      %74 = vector.load %arg6[%c2, %c0_44, %c0_45] : memref<16x8x128xi32, #tpu.memory_space<vmem>>, vector<1x8x128xi32>
      %75 = vector.shape_cast %74 : vector<1x8x128xi32> to vector<8x128xi32>
      %76 = arith.extui %73 : vector<1x8x128xi1> to vector<1x8x128xi32>
      %cst_46 = arith.constant dense<0> : vector<8x128xi32>
      %77 = vector.multi_reduction <add>, %76, %cst_46 [0] : vector<1x8x128xi32> to vector<8x128xi32>
      %78 = arith.addi %75, %77 : vector<8x128xi32>
      %c2_47 = arith.constant 2 : index
      %c0_48 = arith.constant 0 : index
      %c0_49 = arith.constant 0 : index
      %79 = vector.load %arg6[%c2_47, %c0_48, %c0_49] : memref<16x8x128xi32, #tpu.memory_space<vmem>>, vector<1x8x128xi32>
      %80 = vector.shape_cast %79 : vector<1x8x128xi32> to vector<8x128xi32>
      %81 = vector.shape_cast %78 : vector<8x128xi32> to vector<1x8x128xi32>
      tpu.vector_store %arg6[%c2_47, %c0_48, %c0_49], %81 {strides = array<i32>} : memref<16x8x128xi32, #tpu.memory_space<vmem>>, vector<1x8x128xi32>,
      %c2_50 = arith.constant 2 : index
      %c0_51 = arith.constant 0 : index
      %c0_52 = arith.constant 0 : index
      %82 = vector.load %arg7[%c2_50, %c0_51, %c0_52] : memref<16x8x128xf32, #tpu.memory_space<vmem>>, vector<1x8x128xf32>
      %83 = vector.shape_cast %82 : vector<1x8x128xf32> to vector<8x128xf32>
      %cst_53 = arith.constant 0.000000e+00 : f32
      %84 = vector.broadcast %cst_53 : f32 to vector<1x8x128xf32>
      %85 = arith.select %73, %38, %84 : vector<1x8x128xi1>, vector<1x8x128xf32>
      %cst_54 = arith.constant dense<0.000000e+00> : vector<8x128xf32>
      %86 = vector.multi_reduction <add>, %85, %cst_54 [0] : vector<1x8x128xf32> to vector<8x128xf32>
      %87 = arith.addf %83, %86 : vector<8x128xf32>
      %c2_55 = arith.constant 2 : index
      %c0_56 = arith.constant 0 : index
      %c0_57 = arith.constant 0 : index
      %88 = vector.load %arg7[%c2_55, %c0_56, %c0_57] : memref<16x8x128xf32, #tpu.memory_space<vmem>>, vector<1x8x128xf32>
      %89 = vector.shape_cast %88 : vector<1x8x128xf32> to vector<8x128xf32>
      %90 = vector.shape_cast %87 : vector<8x128xf32> to vector<1x8x128xf32>
      tpu.vector_store %arg7[%c2_55, %c0_56, %c0_57], %90 {strides = array<i32>} : memref<16x8x128xf32, #tpu.memory_space<vmem>>, vector<1x8x128xf32>,
      %cst_58 = arith.constant 3.000000e-01 : f32
      %91 = vector.broadcast %cst_58 : f32 to vector<1x8x128xf32>
      %92 = arith.cmpf oge, %37, %91 : vector<1x8x128xf32>
      %c3 = arith.constant 3 : index
      %c0_59 = arith.constant 0 : index
      %c0_60 = arith.constant 0 : index
      %93 = vector.load %arg6[%c3, %c0_59, %c0_60] : memref<16x8x128xi32, #tpu.memory_space<vmem>>, vector<1x8x128xi32>
      %94 = vector.shape_cast %93 : vector<1x8x128xi32> to vector<8x128xi32>
      %95 = arith.extui %92 : vector<1x8x128xi1> to vector<1x8x128xi32>
      %cst_61 = arith.constant dense<0> : vector<8x128xi32>
      %96 = vector.multi_reduction <add>, %95, %cst_61 [0] : vector<1x8x128xi32> to vector<8x128xi32>
      %97 = arith.addi %94, %96 : vector<8x128xi32>
      %c3_62 = arith.constant 3 : index
      %c0_63 = arith.constant 0 : index
      %c0_64 = arith.constant 0 : index
      %98 = vector.load %arg6[%c3_62, %c0_63, %c0_64] : memref<16x8x128xi32, #tpu.memory_space<vmem>>, vector<1x8x128xi32>
      %99 = vector.shape_cast %98 : vector<1x8x128xi32> to vector<8x128xi32>
      %100 = vector.shape_cast %97 : vector<8x128xi32> to vector<1x8x128xi32>
      tpu.vector_store %arg6[%c3_62, %c0_63, %c0_64], %100 {strides = array<i32>} : memref<16x8x128xi32, #tpu.memory_space<vmem>>, vector<1x8x128xi32>,
      %c3_65 = arith.constant 3 : index
      %c0_66 = arith.constant 0 : index
      %c0_67 = arith.constant 0 : index
      %101 = vector.load %arg7[%c3_65, %c0_66, %c0_67] : memref<16x8x128xf32, #tpu.memory_space<vmem>>, vector<1x8x128xf32>
      %102 = vector.shape_cast %101 : vector<1x8x128xf32> to vector<8x128xf32>
      %cst_68 = arith.constant 0.000000e+00 : f32
      %103 = vector.broadcast %cst_68 : f32 to vector<1x8x128xf32>
      %104 = arith.select %92, %38, %103 : vector<1x8x128xi1>, vector<1x8x128xf32>
      %cst_69 = arith.constant dense<0.000000e+00> : vector<8x128xf32>
      %105 = vector.multi_reduction <add>, %104, %cst_69 [0] : vector<1x8x128xf32> to vector<8x128xf32>
      %106 = arith.addf %102, %105 : vector<8x128xf32>
      %c3_70 = arith.constant 3 : index
      %c0_71 = arith.constant 0 : index
      %c0_72 = arith.constant 0 : index
      %107 = vector.load %arg7[%c3_70, %c0_71, %c0_72] : memref<16x8x128xf32, #tpu.memory_space<vmem>>, vector<1x8x128xf32>
      %108 = vector.shape_cast %107 : vector<1x8x128xf32> to vector<8x128xf32>
      %109 = vector.shape_cast %106 : vector<8x128xf32> to vector<1x8x128xf32>
      tpu.vector_store %arg7[%c3_70, %c0_71, %c0_72], %109 {strides = array<i32>} : memref<16x8x128xf32, #tpu.memory_space<vmem>>, vector<1x8x128xf32>,
      %cst_73 = arith.constant 4.000000e-01 : f32
      %110 = vector.broadcast %cst_73 : f32 to vector<1x8x128xf32>
      %111 = arith.cmpf oge, %37, %110 : vector<1x8x128xf32>
      %c4 = arith.constant 4 : index
      %c0_74 = arith.constant 0 : index
      %c0_75 = arith.constant 0 : index
      %112 = vector.load %arg6[%c4, %c0_74, %c0_75] : memref<16x8x128xi32, #tpu.memory_space<vmem>>, vector<1x8x128xi32>
      %113 = vector.shape_cast %112 : vector<1x8x128xi32> to vector<8x128xi32>
      %114 = arith.extui %111 : vector<1x8x128xi1> to vector<1x8x128xi32>
      %cst_76 = arith.constant dense<0> : vector<8x128xi32>
      %115 = vector.multi_reduction <add>, %114, %cst_76 [0] : vector<1x8x128xi32> to vector<8x128xi32>
      %116 = arith.addi %113, %115 : vector<8x128xi32>
      %c4_77 = arith.constant 4 : index
      %c0_78 = arith.constant 0 : index
      %c0_79 = arith.constant 0 : index
      %117 = vector.load %arg6[%c4_77, %c0_78, %c0_79] : memref<16x8x128xi32, #tpu.memory_space<vmem>>, vector<1x8x128xi32>
      %118 = vector.shape_cast %117 : vector<1x8x128xi32> to vector<8x128xi32>
      %119 = vector.shape_cast %116 : vector<8x128xi32> to vector<1x8x128xi32>
      tpu.vector_store %arg6[%c4_77, %c0_78, %c0_79], %119 {strides = array<i32>} : memref<16x8x128xi32, #tpu.memory_space<vmem>>, vector<1x8x128xi32>,
      %c4_80 = arith.constant 4 : index
      %c0_81 = arith.constant 0 : index
      %c0_82 = arith.constant 0 : index
      %120 = vector.load %arg7[%c4_80, %c0_81, %c0_82] : memref<16x8x128xf32, #tpu.memory_space<vmem>>, vector<1x8x128xf32>
      %121 = vector.shape_cast %120 : vector<1x8x128xf32> to vector<8x128xf32>
      %cst_83 = arith.constant 0.000000e+00 : f32
      %122 = vector.broadcast %cst_83 : f32 to vector<1x8x128xf32>
      %123 = arith.select %111, %38, %122 : vector<1x8x128xi1>, vector<1x8x128xf32>
      %cst_84 = arith.constant dense<0.000000e+00> : vector<8x128xf32>
      %124 = vector.multi_reduction <add>, %123, %cst_84 [0] : vector<1x8x128xf32> to vector<8x128xf32>
      %125 = arith.addf %121, %124 : vector<8x128xf32>
      %c4_85 = arith.constant 4 : index
      %c0_86 = arith.constant 0 : index
      %c0_87 = arith.constant 0 : index
      %126 = vector.load %arg7[%c4_85, %c0_86, %c0_87] : memref<16x8x128xf32, #tpu.memory_space<vmem>>, vector<1x8x128xf32>
      %127 = vector.shape_cast %126 : vector<1x8x128xf32> to vector<8x128xf32>
      %128 = vector.shape_cast %125 : vector<8x128xf32> to vector<1x8x128xf32>
      tpu.vector_store %arg7[%c4_85, %c0_86, %c0_87], %128 {strides = array<i32>} : memref<16x8x128xf32, #tpu.memory_space<vmem>>, vector<1x8x128xf32>,
      %cst_88 = arith.constant 5.000000e-01 : f32
      %129 = vector.broadcast %cst_88 : f32 to vector<1x8x128xf32>
      %130 = arith.cmpf oge, %37, %129 : vector<1x8x128xf32>
      %c5 = arith.constant 5 : index
      %c0_89 = arith.constant 0 : index
      %c0_90 = arith.constant 0 : index
      %131 = vector.load %arg6[%c5, %c0_89, %c0_90] : memref<16x8x128xi32, #tpu.memory_space<vmem>>, vector<1x8x128xi32>
      %132 = vector.shape_cast %131 : vector<1x8x128xi32> to vector<8x128xi32>
      %133 = arith.extui %130 : vector<1x8x128xi1> to vector<1x8x128xi32>
      %cst_91 = arith.constant dense<0> : vector<8x128xi32>
      %134 = vector.multi_reduction <add>, %133, %cst_91 [0] : vector<1x8x128xi32> to vector<8x128xi32>
      %135 = arith.addi %132, %134 : vector<8x128xi32>
      %c5_92 = arith.constant 5 : index
      %c0_93 = arith.constant 0 : index
      %c0_94 = arith.constant 0 : index
      %136 = vector.load %arg6[%c5_92, %c0_93, %c0_94] : memref<16x8x128xi32, #tpu.memory_space<vmem>>, vector<1x8x128xi32>
      %137 = vector.shape_cast %136 : vector<1x8x128xi32> to vector<8x128xi32>
      %138 = vector.shape_cast %135 : vector<8x128xi32> to vector<1x8x128xi32>
      tpu.vector_store %arg6[%c5_92, %c0_93, %c0_94], %138 {strides = array<i32>} : memref<16x8x128xi32, #tpu.memory_space<vmem>>, vector<1x8x128xi32>,
      %c5_95 = arith.constant 5 : index
      %c0_96 = arith.constant 0 : index
      %c0_97 = arith.constant 0 : index
      %139 = vector.load %arg7[%c5_95, %c0_96, %c0_97] : memref<16x8x128xf32, #tpu.memory_space<vmem>>, vector<1x8x128xf32>
      %140 = vector.shape_cast %139 : vector<1x8x128xf32> to vector<8x128xf32>
      %cst_98 = arith.constant 0.000000e+00 : f32
      %141 = vector.broadcast %cst_98 : f32 to vector<1x8x128xf32>
      %142 = arith.select %130, %38, %141 : vector<1x8x128xi1>, vector<1x8x128xf32>
      %cst_99 = arith.constant dense<0.000000e+00> : vector<8x128xf32>
      %143 = vector.multi_reduction <add>, %142, %cst_99 [0] : vector<1x8x128xf32> to vector<8x128xf32>
      %144 = arith.addf %140, %143 : vector<8x128xf32>
      %c5_100 = arith.constant 5 : index
      %c0_101 = arith.constant 0 : index
      %c0_102 = arith.constant 0 : index
      %145 = vector.load %arg7[%c5_100, %c0_101, %c0_102] : memref<16x8x128xf32, #tpu.memory_space<vmem>>, vector<1x8x128xf32>
      %146 = vector.shape_cast %145 : vector<1x8x128xf32> to vector<8x128xf32>
      %147 = vector.shape_cast %144 : vector<8x128xf32> to vector<1x8x128xf32>
      tpu.vector_store %arg7[%c5_100, %c0_101, %c0_102], %147 {strides = array<i32>} : memref<16x8x128xf32, #tpu.memory_space<vmem>>, vector<1x8x128xf32>,
      %cst_103 = arith.constant 6.000000e-01 : f32
      %148 = vector.broadcast %cst_103 : f32 to vector<1x8x128xf32>
      %149 = arith.cmpf oge, %37, %148 : vector<1x8x128xf32>
      %c6 = arith.constant 6 : index
      %c0_104 = arith.constant 0 : index
      %c0_105 = arith.constant 0 : index
      %150 = vector.load %arg6[%c6, %c0_104, %c0_105] : memref<16x8x128xi32, #tpu.memory_space<vmem>>, vector<1x8x128xi32>
      %151 = vector.shape_cast %150 : vector<1x8x128xi32> to vector<8x128xi32>
      %152 = arith.extui %149 : vector<1x8x128xi1> to vector<1x8x128xi32>
      %cst_106 = arith.constant dense<0> : vector<8x128xi32>
      %153 = vector.multi_reduction <add>, %152, %cst_106 [0] : vector<1x8x128xi32> to vector<8x128xi32>
      %154 = arith.addi %151, %153 : vector<8x128xi32>
      %c6_107 = arith.constant 6 : index
      %c0_108 = arith.constant 0 : index
      %c0_109 = arith.constant 0 : index
      %155 = vector.load %arg6[%c6_107, %c0_108, %c0_109] : memref<16x8x128xi32, #tpu.memory_space<vmem>>, vector<1x8x128xi32>
      %156 = vector.shape_cast %155 : vector<1x8x128xi32> to vector<8x128xi32>
      %157 = vector.shape_cast %154 : vector<8x128xi32> to vector<1x8x128xi32>
      tpu.vector_store %arg6[%c6_107, %c0_108, %c0_109], %157 {strides = array<i32>} : memref<16x8x128xi32, #tpu.memory_space<vmem>>, vector<1x8x128xi32>,
      %c6_110 = arith.constant 6 : index
      %c0_111 = arith.constant 0 : index
      %c0_112 = arith.constant 0 : index
      %158 = vector.load %arg7[%c6_110, %c0_111, %c0_112] : memref<16x8x128xf32, #tpu.memory_space<vmem>>, vector<1x8x128xf32>
      %159 = vector.shape_cast %158 : vector<1x8x128xf32> to vector<8x128xf32>
      %cst_113 = arith.constant 0.000000e+00 : f32
      %160 = vector.broadcast %cst_113 : f32 to vector<1x8x128xf32>
      %161 = arith.select %149, %38, %160 : vector<1x8x128xi1>, vector<1x8x128xf32>
      %cst_114 = arith.constant dense<0.000000e+00> : vector<8x128xf32>
      %162 = vector.multi_reduction <add>, %161, %cst_114 [0] : vector<1x8x128xf32> to vector<8x128xf32>
      %163 = arith.addf %159, %162 : vector<8x128xf32>
      %c6_115 = arith.constant 6 : index
      %c0_116 = arith.constant 0 : index
      %c0_117 = arith.constant 0 : index
      %164 = vector.load %arg7[%c6_115, %c0_116, %c0_117] : memref<16x8x128xf32, #tpu.memory_space<vmem>>, vector<1x8x128xf32>
      %165 = vector.shape_cast %164 : vector<1x8x128xf32> to vector<8x128xf32>
      %166 = vector.shape_cast %163 : vector<8x128xf32> to vector<1x8x128xf32>
      tpu.vector_store %arg7[%c6_115, %c0_116, %c0_117], %166 {strides = array<i32>} : memref<16x8x128xf32, #tpu.memory_space<vmem>>, vector<1x8x128xf32>,
      %cst_118 = arith.constant 0.699999988 : f32
      %167 = vector.broadcast %cst_118 : f32 to vector<1x8x128xf32>
      %168 = arith.cmpf oge, %37, %167 : vector<1x8x128xf32>
      %c7 = arith.constant 7 : index
      %c0_119 = arith.constant 0 : index
      %c0_120 = arith.constant 0 : index
      %169 = vector.load %arg6[%c7, %c0_119, %c0_120] : memref<16x8x128xi32, #tpu.memory_space<vmem>>, vector<1x8x128xi32>
      %170 = vector.shape_cast %169 : vector<1x8x128xi32> to vector<8x128xi32>
      %171 = arith.extui %168 : vector<1x8x128xi1> to vector<1x8x128xi32>
      %cst_121 = arith.constant dense<0> : vector<8x128xi32>
      %172 = vector.multi_reduction <add>, %171, %cst_121 [0] : vector<1x8x128xi32> to vector<8x128xi32>
      %173 = arith.addi %170, %172 : vector<8x128xi32>
      %c7_122 = arith.constant 7 : index
      %c0_123 = arith.constant 0 : index
      %c0_124 = arith.constant 0 : index
      %174 = vector.load %arg6[%c7_122, %c0_123, %c0_124] : memref<16x8x128xi32, #tpu.memory_space<vmem>>, vector<1x8x128xi32>
      %175 = vector.shape_cast %174 : vector<1x8x128xi32> to vector<8x128xi32>
      %176 = vector.shape_cast %173 : vector<8x128xi32> to vector<1x8x128xi32>
      tpu.vector_store %arg6[%c7_122, %c0_123, %c0_124], %176 {strides = array<i32>} : memref<16x8x128xi32, #tpu.memory_space<vmem>>, vector<1x8x128xi32>,
      %c7_125 = arith.constant 7 : index
      %c0_126 = arith.constant 0 : index
      %c0_127 = arith.constant 0 : index
      %177 = vector.load %arg7[%c7_125, %c0_126, %c0_127] : memref<16x8x128xf32, #tpu.memory_space<vmem>>, vector<1x8x128xf32>
      %178 = vector.shape_cast %177 : vector<1x8x128xf32> to vector<8x128xf32>
      %cst_128 = arith.constant 0.000000e+00 : f32
      %179 = vector.broadcast %cst_128 : f32 to vector<1x8x128xf32>
      %180 = arith.select %168, %38, %179 : vector<1x8x128xi1>, vector<1x8x128xf32>
      %cst_129 = arith.constant dense<0.000000e+00> : vector<8x128xf32>
      %181 = vector.multi_reduction <add>, %180, %cst_129 [0] : vector<1x8x128xf32> to vector<8x128xf32>
      %182 = arith.addf %178, %181 : vector<8x128xf32>
      %c7_130 = arith.constant 7 : index
      %c0_131 = arith.constant 0 : index
      %c0_132 = arith.constant 0 : index
      %183 = vector.load %arg7[%c7_130, %c0_131, %c0_132] : memref<16x8x128xf32, #tpu.memory_space<vmem>>, vector<1x8x128xf32>
      %184 = vector.shape_cast %183 : vector<1x8x128xf32> to vector<8x128xf32>
      %185 = vector.shape_cast %182 : vector<8x128xf32> to vector<1x8x128xf32>
      tpu.vector_store %arg7[%c7_130, %c0_131, %c0_132], %185 {strides = array<i32>} : memref<16x8x128xf32, #tpu.memory_space<vmem>>, vector<1x8x128xf32>,
      %cst_133 = arith.constant 8.000000e-01 : f32
      %186 = vector.broadcast %cst_133 : f32 to vector<1x8x128xf32>
      %187 = arith.cmpf oge, %37, %186 : vector<1x8x128xf32>
      %c8 = arith.constant 8 : index
      %c0_134 = arith.constant 0 : index
      %c0_135 = arith.constant 0 : index
      %188 = vector.load %arg6[%c8, %c0_134, %c0_135] : memref<16x8x128xi32, #tpu.memory_space<vmem>>, vector<1x8x128xi32>
      %189 = vector.shape_cast %188 : vector<1x8x128xi32> to vector<8x128xi32>
      %190 = arith.extui %187 : vector<1x8x128xi1> to vector<1x8x128xi32>
      %cst_136 = arith.constant dense<0> : vector<8x128xi32>
      %191 = vector.multi_reduction <add>, %190, %cst_136 [0] : vector<1x8x128xi32> to vector<8x128xi32>
      %192 = arith.addi %189, %191 : vector<8x128xi32>
      %c8_137 = arith.constant 8 : index
      %c0_138 = arith.constant 0 : index
      %c0_139 = arith.constant 0 : index
      %193 = vector.load %arg6[%c8_137, %c0_138, %c0_139] : memref<16x8x128xi32, #tpu.memory_space<vmem>>, vector<1x8x128xi32>
      %194 = vector.shape_cast %193 : vector<1x8x128xi32> to vector<8x128xi32>
      %195 = vector.shape_cast %192 : vector<8x128xi32> to vector<1x8x128xi32>
      tpu.vector_store %arg6[%c8_137, %c0_138, %c0_139], %195 {strides = array<i32>} : memref<16x8x128xi32, #tpu.memory_space<vmem>>, vector<1x8x128xi32>,
      %c8_140 = arith.constant 8 : index
      %c0_141 = arith.constant 0 : index
      %c0_142 = arith.constant 0 : index
      %196 = vector.load %arg7[%c8_140, %c0_141, %c0_142] : memref<16x8x128xf32, #tpu.memory_space<vmem>>, vector<1x8x128xf32>
      %197 = vector.shape_cast %196 : vector<1x8x128xf32> to vector<8x128xf32>
      %cst_143 = arith.constant 0.000000e+00 : f32
      %198 = vector.broadcast %cst_143 : f32 to vector<1x8x128xf32>
      %199 = arith.select %187, %38, %198 : vector<1x8x128xi1>, vector<1x8x128xf32>
      %cst_144 = arith.constant dense<0.000000e+00> : vector<8x128xf32>
      %200 = vector.multi_reduction <add>, %199, %cst_144 [0] : vector<1x8x128xf32> to vector<8x128xf32>
      %201 = arith.addf %197, %200 : vector<8x128xf32>
      %c8_145 = arith.constant 8 : index
      %c0_146 = arith.constant 0 : index
      %c0_147 = arith.constant 0 : index
      %202 = vector.load %arg7[%c8_145, %c0_146, %c0_147] : memref<16x8x128xf32, #tpu.memory_space<vmem>>, vector<1x8x128xf32>
      %203 = vector.shape_cast %202 : vector<1x8x128xf32> to vector<8x128xf32>
      %204 = vector.shape_cast %201 : vector<8x128xf32> to vector<1x8x128xf32>
      tpu.vector_store %arg7[%c8_145, %c0_146, %c0_147], %204 {strides = array<i32>} : memref<16x8x128xf32, #tpu.memory_space<vmem>>, vector<1x8x128xf32>,
      %cst_148 = arith.constant 0.899999976 : f32
      %205 = vector.broadcast %cst_148 : f32 to vector<1x8x128xf32>
      %206 = arith.cmpf oge, %37, %205 : vector<1x8x128xf32>
      %c9 = arith.constant 9 : index
      %c0_149 = arith.constant 0 : index
      %c0_150 = arith.constant 0 : index
      %207 = vector.load %arg6[%c9, %c0_149, %c0_150] : memref<16x8x128xi32, #tpu.memory_space<vmem>>, vector<1x8x128xi32>
      %208 = vector.shape_cast %207 : vector<1x8x128xi32> to vector<8x128xi32>
      %209 = arith.extui %206 : vector<1x8x128xi1> to vector<1x8x128xi32>
      %cst_151 = arith.constant dense<0> : vector<8x128xi32>
      %210 = vector.multi_reduction <add>, %209, %cst_151 [0] : vector<1x8x128xi32> to vector<8x128xi32>
      %211 = arith.addi %208, %210 : vector<8x128xi32>
      %c9_152 = arith.constant 9 : index
      %c0_153 = arith.constant 0 : index
      %c0_154 = arith.constant 0 : index
      %212 = vector.load %arg6[%c9_152, %c0_153, %c0_154] : memref<16x8x128xi32, #tpu.memory_space<vmem>>, vector<1x8x128xi32>
      %213 = vector.shape_cast %212 : vector<1x8x128xi32> to vector<8x128xi32>
      %214 = vector.shape_cast %211 : vector<8x128xi32> to vector<1x8x128xi32>
      tpu.vector_store %arg6[%c9_152, %c0_153, %c0_154], %214 {strides = array<i32>} : memref<16x8x128xi32, #tpu.memory_space<vmem>>, vector<1x8x128xi32>,
      %c9_155 = arith.constant 9 : index
      %c0_156 = arith.constant 0 : index
      %c0_157 = arith.constant 0 : index
      %215 = vector.load %arg7[%c9_155, %c0_156, %c0_157] : memref<16x8x128xf32, #tpu.memory_space<vmem>>, vector<1x8x128xf32>
      %216 = vector.shape_cast %215 : vector<1x8x128xf32> to vector<8x128xf32>
      %cst_158 = arith.constant 0.000000e+00 : f32
      %217 = vector.broadcast %cst_158 : f32 to vector<1x8x128xf32>
      %218 = arith.select %206, %38, %217 : vector<1x8x128xi1>, vector<1x8x128xf32>
      %cst_159 = arith.constant dense<0.000000e+00> : vector<8x128xf32>
      %219 = vector.multi_reduction <add>, %218, %cst_159 [0] : vector<1x8x128xf32> to vector<8x128xf32>
      %220 = arith.addf %216, %219 : vector<8x128xf32>
      %c9_160 = arith.constant 9 : index
      %c0_161 = arith.constant 0 : index
      %c0_162 = arith.constant 0 : index
      %221 = vector.load %arg7[%c9_160, %c0_161, %c0_162] : memref<16x8x128xf32, #tpu.memory_space<vmem>>, vector<1x8x128xf32>
      %222 = vector.shape_cast %221 : vector<1x8x128xf32> to vector<8x128xf32>
      %223 = vector.shape_cast %220 : vector<8x128xf32> to vector<1x8x128xf32>
      tpu.vector_store %arg7[%c9_160, %c0_161, %c0_162], %223 {strides = array<i32>} : memref<16x8x128xf32, #tpu.memory_space<vmem>>, vector<1x8x128xf32>,
      %cst_163 = arith.constant 1.00000095 : f32
      %224 = vector.broadcast %cst_163 : f32 to vector<1x8x128xf32>
      %225 = arith.cmpf oge, %37, %224 : vector<1x8x128xf32>
      %c10 = arith.constant 10 : index
      %c0_164 = arith.constant 0 : index
      %c0_165 = arith.constant 0 : index
      %226 = vector.load %arg6[%c10, %c0_164, %c0_165] : memref<16x8x128xi32, #tpu.memory_space<vmem>>, vector<1x8x128xi32>
      %227 = vector.shape_cast %226 : vector<1x8x128xi32> to vector<8x128xi32>
      %228 = arith.extui %225 : vector<1x8x128xi1> to vector<1x8x128xi32>
      %cst_166 = arith.constant dense<0> : vector<8x128xi32>
      %229 = vector.multi_reduction <add>, %228, %cst_166 [0] : vector<1x8x128xi32> to vector<8x128xi32>
      %230 = arith.addi %227, %229 : vector<8x128xi32>
      %c10_167 = arith.constant 10 : index
      %c0_168 = arith.constant 0 : index
      %c0_169 = arith.constant 0 : index
      %231 = vector.load %arg6[%c10_167, %c0_168, %c0_169] : memref<16x8x128xi32, #tpu.memory_space<vmem>>, vector<1x8x128xi32>
      %232 = vector.shape_cast %231 : vector<1x8x128xi32> to vector<8x128xi32>
      %233 = vector.shape_cast %230 : vector<8x128xi32> to vector<1x8x128xi32>
      tpu.vector_store %arg6[%c10_167, %c0_168, %c0_169], %233 {strides = array<i32>} : memref<16x8x128xi32, #tpu.memory_space<vmem>>, vector<1x8x128xi32>,
      %c10_170 = arith.constant 10 : index
      %c0_171 = arith.constant 0 : index
      %c0_172 = arith.constant 0 : index
      %234 = vector.load %arg7[%c10_170, %c0_171, %c0_172] : memref<16x8x128xf32, #tpu.memory_space<vmem>>, vector<1x8x128xf32>
      %235 = vector.shape_cast %234 : vector<1x8x128xf32> to vector<8x128xf32>
      %cst_173 = arith.constant 0.000000e+00 : f32
      %236 = vector.broadcast %cst_173 : f32 to vector<1x8x128xf32>
      %237 = arith.select %225, %38, %236 : vector<1x8x128xi1>, vector<1x8x128xf32>
      %cst_174 = arith.constant dense<0.000000e+00> : vector<8x128xf32>
      %238 = vector.multi_reduction <add>, %237, %cst_174 [0] : vector<1x8x128xf32> to vector<8x128xf32>
      %239 = arith.addf %235, %238 : vector<8x128xf32>
      %c10_175 = arith.constant 10 : index
      %c0_176 = arith.constant 0 : index
      %c0_177 = arith.constant 0 : index
      %240 = vector.load %arg7[%c10_175, %c0_176, %c0_177] : memref<16x8x128xf32, #tpu.memory_space<vmem>>, vector<1x8x128xf32>
      %241 = vector.shape_cast %240 : vector<1x8x128xf32> to vector<8x128xf32>
      %242 = vector.shape_cast %239 : vector<8x128xf32> to vector<1x8x128xf32>
      tpu.vector_store %arg7[%c10_175, %c0_176, %c0_177], %242 {strides = array<i32>} : memref<16x8x128xf32, #tpu.memory_space<vmem>>, vector<1x8x128xf32>,
    } else {
    }
    %c8_i32_7 = arith.constant 8 : i32
    %18 = arith.addi %13, %c8_i32_7 : i32
    %c2_i32_8 = arith.constant 2 : i32
    %19 = arith.cmpi sgt, %18, %c2_i32_8 : i32
    %20 = arith.extui %19 : i1 to i32
    %c0_i32_9 = arith.constant 0 : i32
    %21 = arith.cmpi ne, %20, %c0_i32_9 : i32
    scf.if %21 {
      %25 = tpu.iota {dimensions = array<i32: 0>} : vector<8x128xi32>
      %26 = vector.broadcast %13 : i32 to vector<8x128xi32>
      %27 = arith.addi %25, %26 : vector<8x128xi32>
      %c2_i32_13 = arith.constant 2 : i32
      %28 = vector.broadcast %c2_i32_13 : i32 to vector<8x128xi32>
      %29 = arith.cmpi slt, %27, %28 : vector<8x128xi32>
      %cst = arith.constant 2.000000e+00 : f32
      %30 = vector.broadcast %cst : f32 to vector<8x128xf32>
      %31 = arith.select %29, %9, %30 : vector<8x128xi1>, vector<8x128xf32>
      %cst_14 = arith.constant 0.000000e+00 : f32
      %32 = vector.broadcast %cst_14 : f32 to vector<8x128xf32>
      %33 = arith.select %29, %11, %32 : vector<8x128xi1>, vector<8x128xf32>
      %34 = arith.subf %31, %33 : vector<8x128xf32>
      %35 = math.absf %34 : vector<8x128xf32>
      %cst_15 = arith.constant 0.000000e+00 : f32
      %36 = vector.broadcast %cst_15 : f32 to vector<8x128xf32>
      %37 = arith.maximumf %31, %36 : vector<8x128xf32>
      %38 = arith.mulf %31, %33 : vector<8x128xf32>
      %39 = arith.subf %37, %38 : vector<8x128xf32>
      %40 = math.absf %31 : vector<8x128xf32>
      %cst_16 = arith.constant 0.000000e+00 : f32
      %41 = vector.broadcast %cst_16 : f32 to vector<8x128xf32>
      %42 = arith.subf %41, %40 : vector<8x128xf32>
      %43 = math.exp %42 : vector<8x128xf32>
      %44 = math.log1p %43 : vector<8x128xf32>
      %45 = arith.addf %39, %44 : vector<8x128xf32>
      %cst_17 = arith.constant 0.000000e+00 : f32
      %46 = vector.broadcast %cst_17 : f32 to vector<8x128xf32>
      %47 = arith.select %29, %45, %46 : vector<8x128xi1>, vector<8x128xf32>
      %48 = vector.shape_cast %35 : vector<8x128xf32> to vector<1x8x128xf32>
      %49 = vector.shape_cast %47 : vector<8x128xf32> to vector<1x8x128xf32>
      %c0_18 = arith.constant 0 : index
      %c0_19 = arith.constant 0 : index
      %c0_20 = arith.constant 0 : index
      %50 = vector.load %arg6[%c0_18, %c0_19, %c0_20] : memref<16x8x128xi32, #tpu.memory_space<vmem>>, vector<1x8x128xi32>
      %51 = vector.shape_cast %50 : vector<1x8x128xi32> to vector<8x128xi32>
      %c1_i32_21 = arith.constant 1 : i32
      %52 = vector.broadcast %c1_i32_21 : i32 to vector<8x128xi32>
      %53 = arith.addi %51, %52 : vector<8x128xi32>
      %c0_22 = arith.constant 0 : index
      %c0_23 = arith.constant 0 : index
      %c0_24 = arith.constant 0 : index
      %54 = vector.load %arg6[%c0_22, %c0_23, %c0_24] : memref<16x8x128xi32, #tpu.memory_space<vmem>>, vector<1x8x128xi32>
      %55 = vector.shape_cast %54 : vector<1x8x128xi32> to vector<8x128xi32>
      %56 = vector.shape_cast %53 : vector<8x128xi32> to vector<1x8x128xi32>
      tpu.vector_store %arg6[%c0_22, %c0_23, %c0_24], %56 {strides = array<i32>} : memref<16x8x128xi32, #tpu.memory_space<vmem>>, vector<1x8x128xi32>,
      %c0_25 = arith.constant 0 : index
      %c0_26 = arith.constant 0 : index
      %c0_27 = arith.constant 0 : index
      %57 = vector.load %arg7[%c0_25, %c0_26, %c0_27] : memref<16x8x128xf32, #tpu.memory_space<vmem>>, vector<1x8x128xf32>
      %58 = vector.shape_cast %57 : vector<1x8x128xf32> to vector<8x128xf32>
      %cst_28 = arith.constant dense<0.000000e+00> : vector<8x128xf32>
      %59 = vector.multi_reduction <add>, %49, %cst_28 [0] : vector<1x8x128xf32> to vector<8x128xf32>
      %60 = arith.addf %58, %59 : vector<8x128xf32>
      %c0_29 = arith.constant 0 : index
      %c0_30 = arith.constant 0 : index
      %c0_31 = arith.constant 0 : index
      %61 = vector.load %arg7[%c0_29, %c0_30, %c0_31] : memref<16x8x128xf32, #tpu.memory_space<vmem>>, vector<1x8x128xf32>
      %62 = vector.shape_cast %61 : vector<1x8x128xf32> to vector<8x128xf32>
      %63 = vector.shape_cast %60 : vector<8x128xf32> to vector<1x8x128xf32>
      tpu.vector_store %arg7[%c0_29, %c0_30, %c0_31], %63 {strides = array<i32>} : memref<16x8x128xf32, #tpu.memory_space<vmem>>, vector<1x8x128xf32>,
      %cst_32 = arith.constant 1.000000e-01 : f32
      %64 = vector.broadcast %cst_32 : f32 to vector<1x8x128xf32>
      %65 = arith.cmpf oge, %48, %64 : vector<1x8x128xf32>
      %c1 = arith.constant 1 : index
      %c0_33 = arith.constant 0 : index
      %c0_34 = arith.constant 0 : index
      %66 = vector.load %arg6[%c1, %c0_33, %c0_34] : memref<16x8x128xi32, #tpu.memory_space<vmem>>, vector<1x8x128xi32>
      %67 = vector.shape_cast %66 : vector<1x8x128xi32> to vector<8x128xi32>
      %68 = arith.extui %65 : vector<1x8x128xi1> to vector<1x8x128xi32>
      %cst_35 = arith.constant dense<0> : vector<8x128xi32>
      %69 = vector.multi_reduction <add>, %68, %cst_35 [0] : vector<1x8x128xi32> to vector<8x128xi32>
      %70 = arith.addi %67, %69 : vector<8x128xi32>
      %c1_36 = arith.constant 1 : index
      %c0_37 = arith.constant 0 : index
      %c0_38 = arith.constant 0 : index
      %71 = vector.load %arg6[%c1_36, %c0_37, %c0_38] : memref<16x8x128xi32, #tpu.memory_space<vmem>>, vector<1x8x128xi32>
      %72 = vector.shape_cast %71 : vector<1x8x128xi32> to vector<8x128xi32>
      %73 = vector.shape_cast %70 : vector<8x128xi32> to vector<1x8x128xi32>
      tpu.vector_store %arg6[%c1_36, %c0_37, %c0_38], %73 {strides = array<i32>} : memref<16x8x128xi32, #tpu.memory_space<vmem>>, vector<1x8x128xi32>,
      %c1_39 = arith.constant 1 : index
      %c0_40 = arith.constant 0 : index
      %c0_41 = arith.constant 0 : index
      %74 = vector.load %arg7[%c1_39, %c0_40, %c0_41] : memref<16x8x128xf32, #tpu.memory_space<vmem>>, vector<1x8x128xf32>
      %75 = vector.shape_cast %74 : vector<1x8x128xf32> to vector<8x128xf32>
      %cst_42 = arith.constant 0.000000e+00 : f32
      %76 = vector.broadcast %cst_42 : f32 to vector<1x8x128xf32>
      %77 = arith.select %65, %49, %76 : vector<1x8x128xi1>, vector<1x8x128xf32>
      %cst_43 = arith.constant dense<0.000000e+00> : vector<8x128xf32>
      %78 = vector.multi_reduction <add>, %77, %cst_43 [0] : vector<1x8x128xf32> to vector<8x128xf32>
      %79 = arith.addf %75, %78 : vector<8x128xf32>
      %c1_44 = arith.constant 1 : index
      %c0_45 = arith.constant 0 : index
      %c0_46 = arith.constant 0 : index
      %80 = vector.load %arg7[%c1_44, %c0_45, %c0_46] : memref<16x8x128xf32, #tpu.memory_space<vmem>>, vector<1x8x128xf32>
      %81 = vector.shape_cast %80 : vector<1x8x128xf32> to vector<8x128xf32>
      %82 = vector.shape_cast %79 : vector<8x128xf32> to vector<1x8x128xf32>
      tpu.vector_store %arg7[%c1_44, %c0_45, %c0_46], %82 {strides = array<i32>} : memref<16x8x128xf32, #tpu.memory_space<vmem>>, vector<1x8x128xf32>,
      %cst_47 = arith.constant 2.000000e-01 : f32
      %83 = vector.broadcast %cst_47 : f32 to vector<1x8x128xf32>
      %84 = arith.cmpf oge, %48, %83 : vector<1x8x128xf32>
      %c2 = arith.constant 2 : index
      %c0_48 = arith.constant 0 : index
      %c0_49 = arith.constant 0 : index
      %85 = vector.load %arg6[%c2, %c0_48, %c0_49] : memref<16x8x128xi32, #tpu.memory_space<vmem>>, vector<1x8x128xi32>
      %86 = vector.shape_cast %85 : vector<1x8x128xi32> to vector<8x128xi32>
      %87 = arith.extui %84 : vector<1x8x128xi1> to vector<1x8x128xi32>
      %cst_50 = arith.constant dense<0> : vector<8x128xi32>
      %88 = vector.multi_reduction <add>, %87, %cst_50 [0] : vector<1x8x128xi32> to vector<8x128xi32>
      %89 = arith.addi %86, %88 : vector<8x128xi32>
      %c2_51 = arith.constant 2 : index
      %c0_52 = arith.constant 0 : index
      %c0_53 = arith.constant 0 : index
      %90 = vector.load %arg6[%c2_51, %c0_52, %c0_53] : memref<16x8x128xi32, #tpu.memory_space<vmem>>, vector<1x8x128xi32>
      %91 = vector.shape_cast %90 : vector<1x8x128xi32> to vector<8x128xi32>
      %92 = vector.shape_cast %89 : vector<8x128xi32> to vector<1x8x128xi32>
      tpu.vector_store %arg6[%c2_51, %c0_52, %c0_53], %92 {strides = array<i32>} : memref<16x8x128xi32, #tpu.memory_space<vmem>>, vector<1x8x128xi32>,
      %c2_54 = arith.constant 2 : index
      %c0_55 = arith.constant 0 : index
      %c0_56 = arith.constant 0 : index
      %93 = vector.load %arg7[%c2_54, %c0_55, %c0_56] : memref<16x8x128xf32, #tpu.memory_space<vmem>>, vector<1x8x128xf32>
      %94 = vector.shape_cast %93 : vector<1x8x128xf32> to vector<8x128xf32>
      %cst_57 = arith.constant 0.000000e+00 : f32
      %95 = vector.broadcast %cst_57 : f32 to vector<1x8x128xf32>
      %96 = arith.select %84, %49, %95 : vector<1x8x128xi1>, vector<1x8x128xf32>
      %cst_58 = arith.constant dense<0.000000e+00> : vector<8x128xf32>
      %97 = vector.multi_reduction <add>, %96, %cst_58 [0] : vector<1x8x128xf32> to vector<8x128xf32>
      %98 = arith.addf %94, %97 : vector<8x128xf32>
      %c2_59 = arith.constant 2 : index
      %c0_60 = arith.constant 0 : index
      %c0_61 = arith.constant 0 : index
      %99 = vector.load %arg7[%c2_59, %c0_60, %c0_61] : memref<16x8x128xf32, #tpu.memory_space<vmem>>, vector<1x8x128xf32>
      %100 = vector.shape_cast %99 : vector<1x8x128xf32> to vector<8x128xf32>
      %101 = vector.shape_cast %98 : vector<8x128xf32> to vector<1x8x128xf32>
      tpu.vector_store %arg7[%c2_59, %c0_60, %c0_61], %101 {strides = array<i32>} : memref<16x8x128xf32, #tpu.memory_space<vmem>>, vector<1x8x128xf32>,
      %cst_62 = arith.constant 3.000000e-01 : f32
      %102 = vector.broadcast %cst_62 : f32 to vector<1x8x128xf32>
      %103 = arith.cmpf oge, %48, %102 : vector<1x8x128xf32>
      %c3 = arith.constant 3 : index
      %c0_63 = arith.constant 0 : index
      %c0_64 = arith.constant 0 : index
      %104 = vector.load %arg6[%c3, %c0_63, %c0_64] : memref<16x8x128xi32, #tpu.memory_space<vmem>>, vector<1x8x128xi32>
      %105 = vector.shape_cast %104 : vector<1x8x128xi32> to vector<8x128xi32>
      %106 = arith.extui %103 : vector<1x8x128xi1> to vector<1x8x128xi32>
      %cst_65 = arith.constant dense<0> : vector<8x128xi32>
      %107 = vector.multi_reduction <add>, %106, %cst_65 [0] : vector<1x8x128xi32> to vector<8x128xi32>
      %108 = arith.addi %105, %107 : vector<8x128xi32>
      %c3_66 = arith.constant 3 : index
      %c0_67 = arith.constant 0 : index
      %c0_68 = arith.constant 0 : index
      %109 = vector.load %arg6[%c3_66, %c0_67, %c0_68] : memref<16x8x128xi32, #tpu.memory_space<vmem>>, vector<1x8x128xi32>
      %110 = vector.shape_cast %109 : vector<1x8x128xi32> to vector<8x128xi32>
      %111 = vector.shape_cast %108 : vector<8x128xi32> to vector<1x8x128xi32>
      tpu.vector_store %arg6[%c3_66, %c0_67, %c0_68], %111 {strides = array<i32>} : memref<16x8x128xi32, #tpu.memory_space<vmem>>, vector<1x8x128xi32>,
      %c3_69 = arith.constant 3 : index
      %c0_70 = arith.constant 0 : index
      %c0_71 = arith.constant 0 : index
      %112 = vector.load %arg7[%c3_69, %c0_70, %c0_71] : memref<16x8x128xf32, #tpu.memory_space<vmem>>, vector<1x8x128xf32>
      %113 = vector.shape_cast %112 : vector<1x8x128xf32> to vector<8x128xf32>
      %cst_72 = arith.constant 0.000000e+00 : f32
      %114 = vector.broadcast %cst_72 : f32 to vector<1x8x128xf32>
      %115 = arith.select %103, %49, %114 : vector<1x8x128xi1>, vector<1x8x128xf32>
      %cst_73 = arith.constant dense<0.000000e+00> : vector<8x128xf32>
      %116 = vector.multi_reduction <add>, %115, %cst_73 [0] : vector<1x8x128xf32> to vector<8x128xf32>
      %117 = arith.addf %113, %116 : vector<8x128xf32>
      %c3_74 = arith.constant 3 : index
      %c0_75 = arith.constant 0 : index
      %c0_76 = arith.constant 0 : index
      %118 = vector.load %arg7[%c3_74, %c0_75, %c0_76] : memref<16x8x128xf32, #tpu.memory_space<vmem>>, vector<1x8x128xf32>
      %119 = vector.shape_cast %118 : vector<1x8x128xf32> to vector<8x128xf32>
      %120 = vector.shape_cast %117 : vector<8x128xf32> to vector<1x8x128xf32>
      tpu.vector_store %arg7[%c3_74, %c0_75, %c0_76], %120 {strides = array<i32>} : memref<16x8x128xf32, #tpu.memory_space<vmem>>, vector<1x8x128xf32>,
      %cst_77 = arith.constant 4.000000e-01 : f32
      %121 = vector.broadcast %cst_77 : f32 to vector<1x8x128xf32>
      %122 = arith.cmpf oge, %48, %121 : vector<1x8x128xf32>
      %c4 = arith.constant 4 : index
      %c0_78 = arith.constant 0 : index
      %c0_79 = arith.constant 0 : index
      %123 = vector.load %arg6[%c4, %c0_78, %c0_79] : memref<16x8x128xi32, #tpu.memory_space<vmem>>, vector<1x8x128xi32>
      %124 = vector.shape_cast %123 : vector<1x8x128xi32> to vector<8x128xi32>
      %125 = arith.extui %122 : vector<1x8x128xi1> to vector<1x8x128xi32>
      %cst_80 = arith.constant dense<0> : vector<8x128xi32>
      %126 = vector.multi_reduction <add>, %125, %cst_80 [0] : vector<1x8x128xi32> to vector<8x128xi32>
      %127 = arith.addi %124, %126 : vector<8x128xi32>
      %c4_81 = arith.constant 4 : index
      %c0_82 = arith.constant 0 : index
      %c0_83 = arith.constant 0 : index
      %128 = vector.load %arg6[%c4_81, %c0_82, %c0_83] : memref<16x8x128xi32, #tpu.memory_space<vmem>>, vector<1x8x128xi32>
      %129 = vector.shape_cast %128 : vector<1x8x128xi32> to vector<8x128xi32>
      %130 = vector.shape_cast %127 : vector<8x128xi32> to vector<1x8x128xi32>
      tpu.vector_store %arg6[%c4_81, %c0_82, %c0_83], %130 {strides = array<i32>} : memref<16x8x128xi32, #tpu.memory_space<vmem>>, vector<1x8x128xi32>,
      %c4_84 = arith.constant 4 : index
      %c0_85 = arith.constant 0 : index
      %c0_86 = arith.constant 0 : index
      %131 = vector.load %arg7[%c4_84, %c0_85, %c0_86] : memref<16x8x128xf32, #tpu.memory_space<vmem>>, vector<1x8x128xf32>
      %132 = vector.shape_cast %131 : vector<1x8x128xf32> to vector<8x128xf32>
      %cst_87 = arith.constant 0.000000e+00 : f32
      %133 = vector.broadcast %cst_87 : f32 to vector<1x8x128xf32>
      %134 = arith.select %122, %49, %133 : vector<1x8x128xi1>, vector<1x8x128xf32>
      %cst_88 = arith.constant dense<0.000000e+00> : vector<8x128xf32>
      %135 = vector.multi_reduction <add>, %134, %cst_88 [0] : vector<1x8x128xf32> to vector<8x128xf32>
      %136 = arith.addf %132, %135 : vector<8x128xf32>
      %c4_89 = arith.constant 4 : index
      %c0_90 = arith.constant 0 : index
      %c0_91 = arith.constant 0 : index
      %137 = vector.load %arg7[%c4_89, %c0_90, %c0_91] : memref<16x8x128xf32, #tpu.memory_space<vmem>>, vector<1x8x128xf32>
      %138 = vector.shape_cast %137 : vector<1x8x128xf32> to vector<8x128xf32>
      %139 = vector.shape_cast %136 : vector<8x128xf32> to vector<1x8x128xf32>
      tpu.vector_store %arg7[%c4_89, %c0_90, %c0_91], %139 {strides = array<i32>} : memref<16x8x128xf32, #tpu.memory_space<vmem>>, vector<1x8x128xf32>,
      %cst_92 = arith.constant 5.000000e-01 : f32
      %140 = vector.broadcast %cst_92 : f32 to vector<1x8x128xf32>
      %141 = arith.cmpf oge, %48, %140 : vector<1x8x128xf32>
      %c5 = arith.constant 5 : index
      %c0_93 = arith.constant 0 : index
      %c0_94 = arith.constant 0 : index
      %142 = vector.load %arg6[%c5, %c0_93, %c0_94] : memref<16x8x128xi32, #tpu.memory_space<vmem>>, vector<1x8x128xi32>
      %143 = vector.shape_cast %142 : vector<1x8x128xi32> to vector<8x128xi32>
      %144 = arith.extui %141 : vector<1x8x128xi1> to vector<1x8x128xi32>
      %cst_95 = arith.constant dense<0> : vector<8x128xi32>
      %145 = vector.multi_reduction <add>, %144, %cst_95 [0] : vector<1x8x128xi32> to vector<8x128xi32>
      %146 = arith.addi %143, %145 : vector<8x128xi32>
      %c5_96 = arith.constant 5 : index
      %c0_97 = arith.constant 0 : index
      %c0_98 = arith.constant 0 : index
      %147 = vector.load %arg6[%c5_96, %c0_97, %c0_98] : memref<16x8x128xi32, #tpu.memory_space<vmem>>, vector<1x8x128xi32>
      %148 = vector.shape_cast %147 : vector<1x8x128xi32> to vector<8x128xi32>
      %149 = vector.shape_cast %146 : vector<8x128xi32> to vector<1x8x128xi32>
      tpu.vector_store %arg6[%c5_96, %c0_97, %c0_98], %149 {strides = array<i32>} : memref<16x8x128xi32, #tpu.memory_space<vmem>>, vector<1x8x128xi32>,
      %c5_99 = arith.constant 5 : index
      %c0_100 = arith.constant 0 : index
      %c0_101 = arith.constant 0 : index
      %150 = vector.load %arg7[%c5_99, %c0_100, %c0_101] : memref<16x8x128xf32, #tpu.memory_space<vmem>>, vector<1x8x128xf32>
      %151 = vector.shape_cast %150 : vector<1x8x128xf32> to vector<8x128xf32>
      %cst_102 = arith.constant 0.000000e+00 : f32
      %152 = vector.broadcast %cst_102 : f32 to vector<1x8x128xf32>
      %153 = arith.select %141, %49, %152 : vector<1x8x128xi1>, vector<1x8x128xf32>
      %cst_103 = arith.constant dense<0.000000e+00> : vector<8x128xf32>
      %154 = vector.multi_reduction <add>, %153, %cst_103 [0] : vector<1x8x128xf32> to vector<8x128xf32>
      %155 = arith.addf %151, %154 : vector<8x128xf32>
      %c5_104 = arith.constant 5 : index
      %c0_105 = arith.constant 0 : index
      %c0_106 = arith.constant 0 : index
      %156 = vector.load %arg7[%c5_104, %c0_105, %c0_106] : memref<16x8x128xf32, #tpu.memory_space<vmem>>, vector<1x8x128xf32>
      %157 = vector.shape_cast %156 : vector<1x8x128xf32> to vector<8x128xf32>
      %158 = vector.shape_cast %155 : vector<8x128xf32> to vector<1x8x128xf32>
      tpu.vector_store %arg7[%c5_104, %c0_105, %c0_106], %158 {strides = array<i32>} : memref<16x8x128xf32, #tpu.memory_space<vmem>>, vector<1x8x128xf32>,
      %cst_107 = arith.constant 6.000000e-01 : f32
      %159 = vector.broadcast %cst_107 : f32 to vector<1x8x128xf32>
      %160 = arith.cmpf oge, %48, %159 : vector<1x8x128xf32>
      %c6 = arith.constant 6 : index
      %c0_108 = arith.constant 0 : index
      %c0_109 = arith.constant 0 : index
      %161 = vector.load %arg6[%c6, %c0_108, %c0_109] : memref<16x8x128xi32, #tpu.memory_space<vmem>>, vector<1x8x128xi32>
      %162 = vector.shape_cast %161 : vector<1x8x128xi32> to vector<8x128xi32>
      %163 = arith.extui %160 : vector<1x8x128xi1> to vector<1x8x128xi32>
      %cst_110 = arith.constant dense<0> : vector<8x128xi32>
      %164 = vector.multi_reduction <add>, %163, %cst_110 [0] : vector<1x8x128xi32> to vector<8x128xi32>
      %165 = arith.addi %162, %164 : vector<8x128xi32>
      %c6_111 = arith.constant 6 : index
      %c0_112 = arith.constant 0 : index
      %c0_113 = arith.constant 0 : index
      %166 = vector.load %arg6[%c6_111, %c0_112, %c0_113] : memref<16x8x128xi32, #tpu.memory_space<vmem>>, vector<1x8x128xi32>
      %167 = vector.shape_cast %166 : vector<1x8x128xi32> to vector<8x128xi32>
      %168 = vector.shape_cast %165 : vector<8x128xi32> to vector<1x8x128xi32>
      tpu.vector_store %arg6[%c6_111, %c0_112, %c0_113], %168 {strides = array<i32>} : memref<16x8x128xi32, #tpu.memory_space<vmem>>, vector<1x8x128xi32>,
      %c6_114 = arith.constant 6 : index
      %c0_115 = arith.constant 0 : index
      %c0_116 = arith.constant 0 : index
      %169 = vector.load %arg7[%c6_114, %c0_115, %c0_116] : memref<16x8x128xf32, #tpu.memory_space<vmem>>, vector<1x8x128xf32>
      %170 = vector.shape_cast %169 : vector<1x8x128xf32> to vector<8x128xf32>
      %cst_117 = arith.constant 0.000000e+00 : f32
      %171 = vector.broadcast %cst_117 : f32 to vector<1x8x128xf32>
      %172 = arith.select %160, %49, %171 : vector<1x8x128xi1>, vector<1x8x128xf32>
      %cst_118 = arith.constant dense<0.000000e+00> : vector<8x128xf32>
      %173 = vector.multi_reduction <add>, %172, %cst_118 [0] : vector<1x8x128xf32> to vector<8x128xf32>
      %174 = arith.addf %170, %173 : vector<8x128xf32>
      %c6_119 = arith.constant 6 : index
      %c0_120 = arith.constant 0 : index
      %c0_121 = arith.constant 0 : index
      %175 = vector.load %arg7[%c6_119, %c0_120, %c0_121] : memref<16x8x128xf32, #tpu.memory_space<vmem>>, vector<1x8x128xf32>
      %176 = vector.shape_cast %175 : vector<1x8x128xf32> to vector<8x128xf32>
      %177 = vector.shape_cast %174 : vector<8x128xf32> to vector<1x8x128xf32>
      tpu.vector_store %arg7[%c6_119, %c0_120, %c0_121], %177 {strides = array<i32>} : memref<16x8x128xf32, #tpu.memory_space<vmem>>, vector<1x8x128xf32>,
      %cst_122 = arith.constant 0.699999988 : f32
      %178 = vector.broadcast %cst_122 : f32 to vector<1x8x128xf32>
      %179 = arith.cmpf oge, %48, %178 : vector<1x8x128xf32>
      %c7 = arith.constant 7 : index
      %c0_123 = arith.constant 0 : index
      %c0_124 = arith.constant 0 : index
      %180 = vector.load %arg6[%c7, %c0_123, %c0_124] : memref<16x8x128xi32, #tpu.memory_space<vmem>>, vector<1x8x128xi32>
      %181 = vector.shape_cast %180 : vector<1x8x128xi32> to vector<8x128xi32>
      %182 = arith.extui %179 : vector<1x8x128xi1> to vector<1x8x128xi32>
      %cst_125 = arith.constant dense<0> : vector<8x128xi32>
      %183 = vector.multi_reduction <add>, %182, %cst_125 [0] : vector<1x8x128xi32> to vector<8x128xi32>
      %184 = arith.addi %181, %183 : vector<8x128xi32>
      %c7_126 = arith.constant 7 : index
      %c0_127 = arith.constant 0 : index
      %c0_128 = arith.constant 0 : index
      %185 = vector.load %arg6[%c7_126, %c0_127, %c0_128] : memref<16x8x128xi32, #tpu.memory_space<vmem>>, vector<1x8x128xi32>
      %186 = vector.shape_cast %185 : vector<1x8x128xi32> to vector<8x128xi32>
      %187 = vector.shape_cast %184 : vector<8x128xi32> to vector<1x8x128xi32>
      tpu.vector_store %arg6[%c7_126, %c0_127, %c0_128], %187 {strides = array<i32>} : memref<16x8x128xi32, #tpu.memory_space<vmem>>, vector<1x8x128xi32>,
      %c7_129 = arith.constant 7 : index
      %c0_130 = arith.constant 0 : index
      %c0_131 = arith.constant 0 : index
      %188 = vector.load %arg7[%c7_129, %c0_130, %c0_131] : memref<16x8x128xf32, #tpu.memory_space<vmem>>, vector<1x8x128xf32>
      %189 = vector.shape_cast %188 : vector<1x8x128xf32> to vector<8x128xf32>
      %cst_132 = arith.constant 0.000000e+00 : f32
      %190 = vector.broadcast %cst_132 : f32 to vector<1x8x128xf32>
      %191 = arith.select %179, %49, %190 : vector<1x8x128xi1>, vector<1x8x128xf32>
      %cst_133 = arith.constant dense<0.000000e+00> : vector<8x128xf32>
      %192 = vector.multi_reduction <add>, %191, %cst_133 [0] : vector<1x8x128xf32> to vector<8x128xf32>
      %193 = arith.addf %189, %192 : vector<8x128xf32>
      %c7_134 = arith.constant 7 : index
      %c0_135 = arith.constant 0 : index
      %c0_136 = arith.constant 0 : index
      %194 = vector.load %arg7[%c7_134, %c0_135, %c0_136] : memref<16x8x128xf32, #tpu.memory_space<vmem>>, vector<1x8x128xf32>
      %195 = vector.shape_cast %194 : vector<1x8x128xf32> to vector<8x128xf32>
      %196 = vector.shape_cast %193 : vector<8x128xf32> to vector<1x8x128xf32>
      tpu.vector_store %arg7[%c7_134, %c0_135, %c0_136], %196 {strides = array<i32>} : memref<16x8x128xf32, #tpu.memory_space<vmem>>, vector<1x8x128xf32>,
      %cst_137 = arith.constant 8.000000e-01 : f32
      %197 = vector.broadcast %cst_137 : f32 to vector<1x8x128xf32>
      %198 = arith.cmpf oge, %48, %197 : vector<1x8x128xf32>
      %c8 = arith.constant 8 : index
      %c0_138 = arith.constant 0 : index
      %c0_139 = arith.constant 0 : index
      %199 = vector.load %arg6[%c8, %c0_138, %c0_139] : memref<16x8x128xi32, #tpu.memory_space<vmem>>, vector<1x8x128xi32>
      %200 = vector.shape_cast %199 : vector<1x8x128xi32> to vector<8x128xi32>
      %201 = arith.extui %198 : vector<1x8x128xi1> to vector<1x8x128xi32>
      %cst_140 = arith.constant dense<0> : vector<8x128xi32>
      %202 = vector.multi_reduction <add>, %201, %cst_140 [0] : vector<1x8x128xi32> to vector<8x128xi32>
      %203 = arith.addi %200, %202 : vector<8x128xi32>
      %c8_141 = arith.constant 8 : index
      %c0_142 = arith.constant 0 : index
      %c0_143 = arith.constant 0 : index
      %204 = vector.load %arg6[%c8_141, %c0_142, %c0_143] : memref<16x8x128xi32, #tpu.memory_space<vmem>>, vector<1x8x128xi32>
      %205 = vector.shape_cast %204 : vector<1x8x128xi32> to vector<8x128xi32>
      %206 = vector.shape_cast %203 : vector<8x128xi32> to vector<1x8x128xi32>
      tpu.vector_store %arg6[%c8_141, %c0_142, %c0_143], %206 {strides = array<i32>} : memref<16x8x128xi32, #tpu.memory_space<vmem>>, vector<1x8x128xi32>,
      %c8_144 = arith.constant 8 : index
      %c0_145 = arith.constant 0 : index
      %c0_146 = arith.constant 0 : index
      %207 = vector.load %arg7[%c8_144, %c0_145, %c0_146] : memref<16x8x128xf32, #tpu.memory_space<vmem>>, vector<1x8x128xf32>
      %208 = vector.shape_cast %207 : vector<1x8x128xf32> to vector<8x128xf32>
      %cst_147 = arith.constant 0.000000e+00 : f32
      %209 = vector.broadcast %cst_147 : f32 to vector<1x8x128xf32>
      %210 = arith.select %198, %49, %209 : vector<1x8x128xi1>, vector<1x8x128xf32>
      %cst_148 = arith.constant dense<0.000000e+00> : vector<8x128xf32>
      %211 = vector.multi_reduction <add>, %210, %cst_148 [0] : vector<1x8x128xf32> to vector<8x128xf32>
      %212 = arith.addf %208, %211 : vector<8x128xf32>
      %c8_149 = arith.constant 8 : index
      %c0_150 = arith.constant 0 : index
      %c0_151 = arith.constant 0 : index
      %213 = vector.load %arg7[%c8_149, %c0_150, %c0_151] : memref<16x8x128xf32, #tpu.memory_space<vmem>>, vector<1x8x128xf32>
      %214 = vector.shape_cast %213 : vector<1x8x128xf32> to vector<8x128xf32>
      %215 = vector.shape_cast %212 : vector<8x128xf32> to vector<1x8x128xf32>
      tpu.vector_store %arg7[%c8_149, %c0_150, %c0_151], %215 {strides = array<i32>} : memref<16x8x128xf32, #tpu.memory_space<vmem>>, vector<1x8x128xf32>,
      %cst_152 = arith.constant 0.899999976 : f32
      %216 = vector.broadcast %cst_152 : f32 to vector<1x8x128xf32>
      %217 = arith.cmpf oge, %48, %216 : vector<1x8x128xf32>
      %c9 = arith.constant 9 : index
      %c0_153 = arith.constant 0 : index
      %c0_154 = arith.constant 0 : index
      %218 = vector.load %arg6[%c9, %c0_153, %c0_154] : memref<16x8x128xi32, #tpu.memory_space<vmem>>, vector<1x8x128xi32>
      %219 = vector.shape_cast %218 : vector<1x8x128xi32> to vector<8x128xi32>
      %220 = arith.extui %217 : vector<1x8x128xi1> to vector<1x8x128xi32>
      %cst_155 = arith.constant dense<0> : vector<8x128xi32>
      %221 = vector.multi_reduction <add>, %220, %cst_155 [0] : vector<1x8x128xi32> to vector<8x128xi32>
      %222 = arith.addi %219, %221 : vector<8x128xi32>
      %c9_156 = arith.constant 9 : index
      %c0_157 = arith.constant 0 : index
      %c0_158 = arith.constant 0 : index
      %223 = vector.load %arg6[%c9_156, %c0_157, %c0_158] : memref<16x8x128xi32, #tpu.memory_space<vmem>>, vector<1x8x128xi32>
      %224 = vector.shape_cast %223 : vector<1x8x128xi32> to vector<8x128xi32>
      %225 = vector.shape_cast %222 : vector<8x128xi32> to vector<1x8x128xi32>
      tpu.vector_store %arg6[%c9_156, %c0_157, %c0_158], %225 {strides = array<i32>} : memref<16x8x128xi32, #tpu.memory_space<vmem>>, vector<1x8x128xi32>,
      %c9_159 = arith.constant 9 : index
      %c0_160 = arith.constant 0 : index
      %c0_161 = arith.constant 0 : index
      %226 = vector.load %arg7[%c9_159, %c0_160, %c0_161] : memref<16x8x128xf32, #tpu.memory_space<vmem>>, vector<1x8x128xf32>
      %227 = vector.shape_cast %226 : vector<1x8x128xf32> to vector<8x128xf32>
      %cst_162 = arith.constant 0.000000e+00 : f32
      %228 = vector.broadcast %cst_162 : f32 to vector<1x8x128xf32>
      %229 = arith.select %217, %49, %228 : vector<1x8x128xi1>, vector<1x8x128xf32>
      %cst_163 = arith.constant dense<0.000000e+00> : vector<8x128xf32>
      %230 = vector.multi_reduction <add>, %229, %cst_163 [0] : vector<1x8x128xf32> to vector<8x128xf32>
      %231 = arith.addf %227, %230 : vector<8x128xf32>
      %c9_164 = arith.constant 9 : index
      %c0_165 = arith.constant 0 : index
      %c0_166 = arith.constant 0 : index
      %232 = vector.load %arg7[%c9_164, %c0_165, %c0_166] : memref<16x8x128xf32, #tpu.memory_space<vmem>>, vector<1x8x128xf32>
      %233 = vector.shape_cast %232 : vector<1x8x128xf32> to vector<8x128xf32>
      %234 = vector.shape_cast %231 : vector<8x128xf32> to vector<1x8x128xf32>
      tpu.vector_store %arg7[%c9_164, %c0_165, %c0_166], %234 {strides = array<i32>} : memref<16x8x128xf32, #tpu.memory_space<vmem>>, vector<1x8x128xf32>,
      %cst_167 = arith.constant 1.00000095 : f32
      %235 = vector.broadcast %cst_167 : f32 to vector<1x8x128xf32>
      %236 = arith.cmpf oge, %48, %235 : vector<1x8x128xf32>
      %c10 = arith.constant 10 : index
      %c0_168 = arith.constant 0 : index
      %c0_169 = arith.constant 0 : index
      %237 = vector.load %arg6[%c10, %c0_168, %c0_169] : memref<16x8x128xi32, #tpu.memory_space<vmem>>, vector<1x8x128xi32>
      %238 = vector.shape_cast %237 : vector<1x8x128xi32> to vector<8x128xi32>
      %239 = arith.extui %236 : vector<1x8x128xi1> to vector<1x8x128xi32>
      %cst_170 = arith.constant dense<0> : vector<8x128xi32>
      %240 = vector.multi_reduction <add>, %239, %cst_170 [0] : vector<1x8x128xi32> to vector<8x128xi32>
      %241 = arith.addi %238, %240 : vector<8x128xi32>
      %c10_171 = arith.constant 10 : index
      %c0_172 = arith.constant 0 : index
      %c0_173 = arith.constant 0 : index
      %242 = vector.load %arg6[%c10_171, %c0_172, %c0_173] : memref<16x8x128xi32, #tpu.memory_space<vmem>>, vector<1x8x128xi32>
      %243 = vector.shape_cast %242 : vector<1x8x128xi32> to vector<8x128xi32>
      %244 = vector.shape_cast %241 : vector<8x128xi32> to vector<1x8x128xi32>
      tpu.vector_store %arg6[%c10_171, %c0_172, %c0_173], %244 {strides = array<i32>} : memref<16x8x128xi32, #tpu.memory_space<vmem>>, vector<1x8x128xi32>,
      %c10_174 = arith.constant 10 : index
      %c0_175 = arith.constant 0 : index
      %c0_176 = arith.constant 0 : index
      %245 = vector.load %arg7[%c10_174, %c0_175, %c0_176] : memref<16x8x128xf32, #tpu.memory_space<vmem>>, vector<1x8x128xf32>
      %246 = vector.shape_cast %245 : vector<1x8x128xf32> to vector<8x128xf32>
      %cst_177 = arith.constant 0.000000e+00 : f32
      %247 = vector.broadcast %cst_177 : f32 to vector<1x8x128xf32>
      %248 = arith.select %236, %49, %247 : vector<1x8x128xi1>, vector<1x8x128xf32>
      %cst_178 = arith.constant dense<0.000000e+00> : vector<8x128xf32>
      %249 = vector.multi_reduction <add>, %248, %cst_178 [0] : vector<1x8x128xf32> to vector<8x128xf32>
      %250 = arith.addf %246, %249 : vector<8x128xf32>
      %c10_179 = arith.constant 10 : index
      %c0_180 = arith.constant 0 : index
      %c0_181 = arith.constant 0 : index
      %251 = vector.load %arg7[%c10_179, %c0_180, %c0_181] : memref<16x8x128xf32, #tpu.memory_space<vmem>>, vector<1x8x128xf32>
      %252 = vector.shape_cast %251 : vector<1x8x128xf32> to vector<8x128xf32>
      %253 = vector.shape_cast %250 : vector<8x128xf32> to vector<1x8x128xf32>
      tpu.vector_store %arg7[%c10_179, %c0_180, %c0_181], %253 {strides = array<i32>} : memref<16x8x128xf32, #tpu.memory_space<vmem>>, vector<1x8x128xf32>,
    } else {
    }
    %c1_i32_10 = arith.constant 1 : i32
    %c0_i32_11 = arith.constant 0 : i32
    %22 = arith.cmpi eq, %arg1, %c0_i32_11 : i32
    %23 = arith.extui %22 : i1 to i32
    %c0_i32_12 = arith.constant 0 : i32
    %24 = arith.cmpi ne, %23, %c0_i32_12 : i32
    scf.if %24 {
      %c0_i32_13 = arith.constant 0 : i32
      %25 = vector.broadcast %c0_i32_13 : i32 to vector<16x128xi32>
      %c0_14 = arith.constant 0 : index
      %c0_15 = arith.constant 0 : index
      %c0_16 = arith.constant 0 : index
      %26 = vector.load %arg4[%c0_14, %c0_15, %c0_16] : memref<1x16x128xi32, #tpu.memory_space<vmem>>, vector<1x16x128xi32>
      %27 = vector.shape_cast %26 : vector<1x16x128xi32> to vector<16x128xi32>
      %28 = vector.shape_cast %25 : vector<16x128xi32> to vector<1x16x128xi32>
      tpu.vector_store %arg4[%c0_14, %c0_15, %c0_16], %28 {strides = array<i32>} : memref<1x16x128xi32, #tpu.memory_space<vmem>>, vector<1x16x128xi32>,
      %cst = arith.constant 0.000000e+00 : f32
      %29 = vector.broadcast %cst : f32 to vector<16x128xf32>
      %c0_17 = arith.constant 0 : index
      %c0_18 = arith.constant 0 : index
      %c0_19 = arith.constant 0 : index
      %30 = vector.load %arg5[%c0_17, %c0_18, %c0_19] : memref<1x16x128xf32, #tpu.memory_space<vmem>>, vector<1x16x128xf32>
      %31 = vector.shape_cast %30 : vector<1x16x128xf32> to vector<16x128xf32>
      %32 = vector.shape_cast %29 : vector<16x128xf32> to vector<1x16x128xf32>
      tpu.vector_store %arg5[%c0_17, %c0_18, %c0_19], %32 {strides = array<i32>} : memref<1x16x128xf32, #tpu.memory_space<vmem>>, vector<1x16x128xf32>,
      %c0_20 = arith.constant 0 : index
      %c0_21 = arith.constant 0 : index
      %c0_22 = arith.constant 0 : index
      %33 = vector.load %arg6[%c0_20, %c0_21, %c0_22] : memref<16x8x128xi32, #tpu.memory_space<vmem>>, vector<1x8x128xi32>
      %34 = vector.shape_cast %33 : vector<1x8x128xi32> to vector<8x128xi32>
      %cst_23 = arith.constant dense<0> : vector<128xi32>
      %35 = vector.multi_reduction <add>, %34, %cst_23 [0] : vector<8x128xi32> to vector<128xi32>
      %36 = vector.shape_cast %35 : vector<128xi32> to vector<1x128xi32>
      %c0_24 = arith.constant 0 : index
      %c0_25 = arith.constant 0 : index
      %c0_26 = arith.constant 0 : index
      %37 = vector.load %arg7[%c0_24, %c0_25, %c0_26] : memref<16x8x128xf32, #tpu.memory_space<vmem>>, vector<1x8x128xf32>
      %38 = vector.shape_cast %37 : vector<1x8x128xf32> to vector<8x128xf32>
      %cst_27 = arith.constant dense<0.000000e+00> : vector<128xf32>
      %39 = vector.multi_reduction <add>, %38, %cst_27 [0] : vector<8x128xf32> to vector<128xf32>
      %40 = vector.shape_cast %39 : vector<128xf32> to vector<1x128xf32>
      %cst_28 = arith.constant dense<0> : vector<1xi32>
      %41 = vector.multi_reduction <add>, %36, %cst_28 [1] : vector<1x128xi32> to vector<1xi32>
      %42 = vector.shape_cast %41 : vector<1xi32> to vector<1x1xi32>
      %cst_29 = arith.constant dense<0.000000e+00> : vector<1xf32>
      %43 = vector.multi_reduction <add>, %40, %cst_29 [1] : vector<1x128xf32> to vector<1xf32>
      %44 = vector.shape_cast %43 : vector<1xf32> to vector<1x1xf32>
      %45 = vector.shape_cast %42 : vector<1x1xi32> to vector<1x1xi32>
      %46 = vector.broadcast %45 : vector<1x1xi32> to vector<1x128xi32>
      %c0_30 = arith.constant 0 : index
      %c0_31 = arith.constant 0 : index
      %c0_32 = arith.constant 0 : index
      %47 = vector.load %arg4[%c0_30, %c0_31, %c0_32] : memref<1x16x128xi32, #tpu.memory_space<vmem>>, vector<1x1x128xi32>
      %48 = vector.shape_cast %47 : vector<1x1x128xi32> to vector<1x128xi32>
      %49 = vector.shape_cast %46 : vector<1x128xi32> to vector<1x1x128xi32>
      tpu.vector_store %arg4[%c0_30, %c0_31, %c0_32], %49 {strides = array<i32>} : memref<1x16x128xi32, #tpu.memory_space<vmem>>, vector<1x1x128xi32>,
      %50 = vector.shape_cast %44 : vector<1x1xf32> to vector<1x1xf32>
      %51 = vector.broadcast %50 : vector<1x1xf32> to vector<1x128xf32>
      %c0_33 = arith.constant 0 : index
      %c0_34 = arith.constant 0 : index
      %c0_35 = arith.constant 0 : index
      %52 = vector.load %arg5[%c0_33, %c0_34, %c0_35] : memref<1x16x128xf32, #tpu.memory_space<vmem>>, vector<1x1x128xf32>
      %53 = vector.shape_cast %52 : vector<1x1x128xf32> to vector<1x128xf32>
      %54 = vector.shape_cast %51 : vector<1x128xf32> to vector<1x1x128xf32>
      tpu.vector_store %arg5[%c0_33, %c0_34, %c0_35], %54 {strides = array<i32>} : memref<1x16x128xf32, #tpu.memory_space<vmem>>, vector<1x1x128xf32>,
      %c1 = arith.constant 1 : index
      %c0_36 = arith.constant 0 : index
      %c0_37 = arith.constant 0 : index
      %55 = vector.load %arg6[%c1, %c0_36, %c0_37] : memref<16x8x128xi32, #tpu.memory_space<vmem>>, vector<1x8x128xi32>
      %56 = vector.shape_cast %55 : vector<1x8x128xi32> to vector<8x128xi32>
      %cst_38 = arith.constant dense<0> : vector<128xi32>
      %57 = vector.multi_reduction <add>, %56, %cst_38 [0] : vector<8x128xi32> to vector<128xi32>
      %58 = vector.shape_cast %57 : vector<128xi32> to vector<1x128xi32>
      %c1_39 = arith.constant 1 : index
      %c0_40 = arith.constant 0 : index
      %c0_41 = arith.constant 0 : index
      %59 = vector.load %arg7[%c1_39, %c0_40, %c0_41] : memref<16x8x128xf32, #tpu.memory_space<vmem>>, vector<1x8x128xf32>
      %60 = vector.shape_cast %59 : vector<1x8x128xf32> to vector<8x128xf32>
      %cst_42 = arith.constant dense<0.000000e+00> : vector<128xf32>
      %61 = vector.multi_reduction <add>, %60, %cst_42 [0] : vector<8x128xf32> to vector<128xf32>
      %62 = vector.shape_cast %61 : vector<128xf32> to vector<1x128xf32>
      %cst_43 = arith.constant dense<0> : vector<1xi32>
      %63 = vector.multi_reduction <add>, %58, %cst_43 [1] : vector<1x128xi32> to vector<1xi32>
      %64 = vector.shape_cast %63 : vector<1xi32> to vector<1x1xi32>
      %cst_44 = arith.constant dense<0.000000e+00> : vector<1xf32>
      %65 = vector.multi_reduction <add>, %62, %cst_44 [1] : vector<1x128xf32> to vector<1xf32>
      %66 = vector.shape_cast %65 : vector<1xf32> to vector<1x1xf32>
      %67 = vector.shape_cast %64 : vector<1x1xi32> to vector<1x1xi32>
      %68 = vector.broadcast %67 : vector<1x1xi32> to vector<1x128xi32>
      %c0_45 = arith.constant 0 : index
      %c1_46 = arith.constant 1 : index
      %c0_47 = arith.constant 0 : index
      %69 = vector.load %arg4[%c0_45, %c1_46, %c0_47] : memref<1x16x128xi32, #tpu.memory_space<vmem>>, vector<1x1x128xi32>
      %70 = vector.shape_cast %69 : vector<1x1x128xi32> to vector<1x128xi32>
      %71 = vector.shape_cast %68 : vector<1x128xi32> to vector<1x1x128xi32>
      tpu.vector_store %arg4[%c0_45, %c1_46, %c0_47], %71 {strides = array<i32>} : memref<1x16x128xi32, #tpu.memory_space<vmem>>, vector<1x1x128xi32>,
      %72 = vector.shape_cast %66 : vector<1x1xf32> to vector<1x1xf32>
      %73 = vector.broadcast %72 : vector<1x1xf32> to vector<1x128xf32>
      %c0_48 = arith.constant 0 : index
      %c1_49 = arith.constant 1 : index
      %c0_50 = arith.constant 0 : index
      %74 = vector.load %arg5[%c0_48, %c1_49, %c0_50] : memref<1x16x128xf32, #tpu.memory_space<vmem>>, vector<1x1x128xf32>
      %75 = vector.shape_cast %74 : vector<1x1x128xf32> to vector<1x128xf32>
      %76 = vector.shape_cast %73 : vector<1x128xf32> to vector<1x1x128xf32>
      tpu.vector_store %arg5[%c0_48, %c1_49, %c0_50], %76 {strides = array<i32>} : memref<1x16x128xf32, #tpu.memory_space<vmem>>, vector<1x1x128xf32>,
      %c2 = arith.constant 2 : index
      %c0_51 = arith.constant 0 : index
      %c0_52 = arith.constant 0 : index
      %77 = vector.load %arg6[%c2, %c0_51, %c0_52] : memref<16x8x128xi32, #tpu.memory_space<vmem>>, vector<1x8x128xi32>
      %78 = vector.shape_cast %77 : vector<1x8x128xi32> to vector<8x128xi32>
      %cst_53 = arith.constant dense<0> : vector<128xi32>
      %79 = vector.multi_reduction <add>, %78, %cst_53 [0] : vector<8x128xi32> to vector<128xi32>
      %80 = vector.shape_cast %79 : vector<128xi32> to vector<1x128xi32>
      %c2_54 = arith.constant 2 : index
      %c0_55 = arith.constant 0 : index
      %c0_56 = arith.constant 0 : index
      %81 = vector.load %arg7[%c2_54, %c0_55, %c0_56] : memref<16x8x128xf32, #tpu.memory_space<vmem>>, vector<1x8x128xf32>
      %82 = vector.shape_cast %81 : vector<1x8x128xf32> to vector<8x128xf32>
      %cst_57 = arith.constant dense<0.000000e+00> : vector<128xf32>
      %83 = vector.multi_reduction <add>, %82, %cst_57 [0] : vector<8x128xf32> to vector<128xf32>
      %84 = vector.shape_cast %83 : vector<128xf32> to vector<1x128xf32>
      %cst_58 = arith.constant dense<0> : vector<1xi32>
      %85 = vector.multi_reduction <add>, %80, %cst_58 [1] : vector<1x128xi32> to vector<1xi32>
      %86 = vector.shape_cast %85 : vector<1xi32> to vector<1x1xi32>
      %cst_59 = arith.constant dense<0.000000e+00> : vector<1xf32>
      %87 = vector.multi_reduction <add>, %84, %cst_59 [1] : vector<1x128xf32> to vector<1xf32>
      %88 = vector.shape_cast %87 : vector<1xf32> to vector<1x1xf32>
      %89 = vector.shape_cast %86 : vector<1x1xi32> to vector<1x1xi32>
      %90 = vector.broadcast %89 : vector<1x1xi32> to vector<1x128xi32>
      %c0_60 = arith.constant 0 : index
      %c2_61 = arith.constant 2 : index
      %c0_62 = arith.constant 0 : index
      %91 = vector.load %arg4[%c0_60, %c2_61, %c0_62] : memref<1x16x128xi32, #tpu.memory_space<vmem>>, vector<1x1x128xi32>
      %92 = vector.shape_cast %91 : vector<1x1x128xi32> to vector<1x128xi32>
      %93 = vector.shape_cast %90 : vector<1x128xi32> to vector<1x1x128xi32>
      tpu.vector_store %arg4[%c0_60, %c2_61, %c0_62], %93 {strides = array<i32>} : memref<1x16x128xi32, #tpu.memory_space<vmem>>, vector<1x1x128xi32>,
      %94 = vector.shape_cast %88 : vector<1x1xf32> to vector<1x1xf32>
      %95 = vector.broadcast %94 : vector<1x1xf32> to vector<1x128xf32>
      %c0_63 = arith.constant 0 : index
      %c2_64 = arith.constant 2 : index
      %c0_65 = arith.constant 0 : index
      %96 = vector.load %arg5[%c0_63, %c2_64, %c0_65] : memref<1x16x128xf32, #tpu.memory_space<vmem>>, vector<1x1x128xf32>
      %97 = vector.shape_cast %96 : vector<1x1x128xf32> to vector<1x128xf32>
      %98 = vector.shape_cast %95 : vector<1x128xf32> to vector<1x1x128xf32>
      tpu.vector_store %arg5[%c0_63, %c2_64, %c0_65], %98 {strides = array<i32>} : memref<1x16x128xf32, #tpu.memory_space<vmem>>, vector<1x1x128xf32>,
      %c3 = arith.constant 3 : index
      %c0_66 = arith.constant 0 : index
      %c0_67 = arith.constant 0 : index
      %99 = vector.load %arg6[%c3, %c0_66, %c0_67] : memref<16x8x128xi32, #tpu.memory_space<vmem>>, vector<1x8x128xi32>
      %100 = vector.shape_cast %99 : vector<1x8x128xi32> to vector<8x128xi32>
      %cst_68 = arith.constant dense<0> : vector<128xi32>
      %101 = vector.multi_reduction <add>, %100, %cst_68 [0] : vector<8x128xi32> to vector<128xi32>
      %102 = vector.shape_cast %101 : vector<128xi32> to vector<1x128xi32>
      %c3_69 = arith.constant 3 : index
      %c0_70 = arith.constant 0 : index
      %c0_71 = arith.constant 0 : index
      %103 = vector.load %arg7[%c3_69, %c0_70, %c0_71] : memref<16x8x128xf32, #tpu.memory_space<vmem>>, vector<1x8x128xf32>
      %104 = vector.shape_cast %103 : vector<1x8x128xf32> to vector<8x128xf32>
      %cst_72 = arith.constant dense<0.000000e+00> : vector<128xf32>
      %105 = vector.multi_reduction <add>, %104, %cst_72 [0] : vector<8x128xf32> to vector<128xf32>
      %106 = vector.shape_cast %105 : vector<128xf32> to vector<1x128xf32>
      %cst_73 = arith.constant dense<0> : vector<1xi32>
      %107 = vector.multi_reduction <add>, %102, %cst_73 [1] : vector<1x128xi32> to vector<1xi32>
      %108 = vector.shape_cast %107 : vector<1xi32> to vector<1x1xi32>
      %cst_74 = arith.constant dense<0.000000e+00> : vector<1xf32>
      %109 = vector.multi_reduction <add>, %106, %cst_74 [1] : vector<1x128xf32> to vector<1xf32>
      %110 = vector.shape_cast %109 : vector<1xf32> to vector<1x1xf32>
      %111 = vector.shape_cast %108 : vector<1x1xi32> to vector<1x1xi32>
      %112 = vector.broadcast %111 : vector<1x1xi32> to vector<1x128xi32>
      %c0_75 = arith.constant 0 : index
      %c3_76 = arith.constant 3 : index
      %c0_77 = arith.constant 0 : index
      %113 = vector.load %arg4[%c0_75, %c3_76, %c0_77] : memref<1x16x128xi32, #tpu.memory_space<vmem>>, vector<1x1x128xi32>
      %114 = vector.shape_cast %113 : vector<1x1x128xi32> to vector<1x128xi32>
      %115 = vector.shape_cast %112 : vector<1x128xi32> to vector<1x1x128xi32>
      tpu.vector_store %arg4[%c0_75, %c3_76, %c0_77], %115 {strides = array<i32>} : memref<1x16x128xi32, #tpu.memory_space<vmem>>, vector<1x1x128xi32>,
      %116 = vector.shape_cast %110 : vector<1x1xf32> to vector<1x1xf32>
      %117 = vector.broadcast %116 : vector<1x1xf32> to vector<1x128xf32>
      %c0_78 = arith.constant 0 : index
      %c3_79 = arith.constant 3 : index
      %c0_80 = arith.constant 0 : index
      %118 = vector.load %arg5[%c0_78, %c3_79, %c0_80] : memref<1x16x128xf32, #tpu.memory_space<vmem>>, vector<1x1x128xf32>
      %119 = vector.shape_cast %118 : vector<1x1x128xf32> to vector<1x128xf32>
      %120 = vector.shape_cast %117 : vector<1x128xf32> to vector<1x1x128xf32>
      tpu.vector_store %arg5[%c0_78, %c3_79, %c0_80], %120 {strides = array<i32>} : memref<1x16x128xf32, #tpu.memory_space<vmem>>, vector<1x1x128xf32>,
      %c4 = arith.constant 4 : index
      %c0_81 = arith.constant 0 : index
      %c0_82 = arith.constant 0 : index
      %121 = vector.load %arg6[%c4, %c0_81, %c0_82] : memref<16x8x128xi32, #tpu.memory_space<vmem>>, vector<1x8x128xi32>
      %122 = vector.shape_cast %121 : vector<1x8x128xi32> to vector<8x128xi32>
      %cst_83 = arith.constant dense<0> : vector<128xi32>
      %123 = vector.multi_reduction <add>, %122, %cst_83 [0] : vector<8x128xi32> to vector<128xi32>
      %124 = vector.shape_cast %123 : vector<128xi32> to vector<1x128xi32>
      %c4_84 = arith.constant 4 : index
      %c0_85 = arith.constant 0 : index
      %c0_86 = arith.constant 0 : index
      %125 = vector.load %arg7[%c4_84, %c0_85, %c0_86] : memref<16x8x128xf32, #tpu.memory_space<vmem>>, vector<1x8x128xf32>
      %126 = vector.shape_cast %125 : vector<1x8x128xf32> to vector<8x128xf32>
      %cst_87 = arith.constant dense<0.000000e+00> : vector<128xf32>
      %127 = vector.multi_reduction <add>, %126, %cst_87 [0] : vector<8x128xf32> to vector<128xf32>
      %128 = vector.shape_cast %127 : vector<128xf32> to vector<1x128xf32>
      %cst_88 = arith.constant dense<0> : vector<1xi32>
      %129 = vector.multi_reduction <add>, %124, %cst_88 [1] : vector<1x128xi32> to vector<1xi32>
      %130 = vector.shape_cast %129 : vector<1xi32> to vector<1x1xi32>
      %cst_89 = arith.constant dense<0.000000e+00> : vector<1xf32>
      %131 = vector.multi_reduction <add>, %128, %cst_89 [1] : vector<1x128xf32> to vector<1xf32>
      %132 = vector.shape_cast %131 : vector<1xf32> to vector<1x1xf32>
      %133 = vector.shape_cast %130 : vector<1x1xi32> to vector<1x1xi32>
      %134 = vector.broadcast %133 : vector<1x1xi32> to vector<1x128xi32>
      %c0_90 = arith.constant 0 : index
      %c4_91 = arith.constant 4 : index
      %c0_92 = arith.constant 0 : index
      %135 = vector.load %arg4[%c0_90, %c4_91, %c0_92] : memref<1x16x128xi32, #tpu.memory_space<vmem>>, vector<1x1x128xi32>
      %136 = vector.shape_cast %135 : vector<1x1x128xi32> to vector<1x128xi32>
      %137 = vector.shape_cast %134 : vector<1x128xi32> to vector<1x1x128xi32>
      tpu.vector_store %arg4[%c0_90, %c4_91, %c0_92], %137 {strides = array<i32>} : memref<1x16x128xi32, #tpu.memory_space<vmem>>, vector<1x1x128xi32>,
      %138 = vector.shape_cast %132 : vector<1x1xf32> to vector<1x1xf32>
      %139 = vector.broadcast %138 : vector<1x1xf32> to vector<1x128xf32>
      %c0_93 = arith.constant 0 : index
      %c4_94 = arith.constant 4 : index
      %c0_95 = arith.constant 0 : index
      %140 = vector.load %arg5[%c0_93, %c4_94, %c0_95] : memref<1x16x128xf32, #tpu.memory_space<vmem>>, vector<1x1x128xf32>
      %141 = vector.shape_cast %140 : vector<1x1x128xf32> to vector<1x128xf32>
      %142 = vector.shape_cast %139 : vector<1x128xf32> to vector<1x1x128xf32>
      tpu.vector_store %arg5[%c0_93, %c4_94, %c0_95], %142 {strides = array<i32>} : memref<1x16x128xf32, #tpu.memory_space<vmem>>, vector<1x1x128xf32>,
      %c5 = arith.constant 5 : index
      %c0_96 = arith.constant 0 : index
      %c0_97 = arith.constant 0 : index
      %143 = vector.load %arg6[%c5, %c0_96, %c0_97] : memref<16x8x128xi32, #tpu.memory_space<vmem>>, vector<1x8x128xi32>
      %144 = vector.shape_cast %143 : vector<1x8x128xi32> to vector<8x128xi32>
      %cst_98 = arith.constant dense<0> : vector<128xi32>
      %145 = vector.multi_reduction <add>, %144, %cst_98 [0] : vector<8x128xi32> to vector<128xi32>
      %146 = vector.shape_cast %145 : vector<128xi32> to vector<1x128xi32>
      %c5_99 = arith.constant 5 : index
      %c0_100 = arith.constant 0 : index
      %c0_101 = arith.constant 0 : index
      %147 = vector.load %arg7[%c5_99, %c0_100, %c0_101] : memref<16x8x128xf32, #tpu.memory_space<vmem>>, vector<1x8x128xf32>
      %148 = vector.shape_cast %147 : vector<1x8x128xf32> to vector<8x128xf32>
      %cst_102 = arith.constant dense<0.000000e+00> : vector<128xf32>
      %149 = vector.multi_reduction <add>, %148, %cst_102 [0] : vector<8x128xf32> to vector<128xf32>
      %150 = vector.shape_cast %149 : vector<128xf32> to vector<1x128xf32>
      %cst_103 = arith.constant dense<0> : vector<1xi32>
      %151 = vector.multi_reduction <add>, %146, %cst_103 [1] : vector<1x128xi32> to vector<1xi32>
      %152 = vector.shape_cast %151 : vector<1xi32> to vector<1x1xi32>
      %cst_104 = arith.constant dense<0.000000e+00> : vector<1xf32>
      %153 = vector.multi_reduction <add>, %150, %cst_104 [1] : vector<1x128xf32> to vector<1xf32>
      %154 = vector.shape_cast %153 : vector<1xf32> to vector<1x1xf32>
      %155 = vector.shape_cast %152 : vector<1x1xi32> to vector<1x1xi32>
      %156 = vector.broadcast %155 : vector<1x1xi32> to vector<1x128xi32>
      %c0_105 = arith.constant 0 : index
      %c5_106 = arith.constant 5 : index
      %c0_107 = arith.constant 0 : index
      %157 = vector.load %arg4[%c0_105, %c5_106, %c0_107] : memref<1x16x128xi32, #tpu.memory_space<vmem>>, vector<1x1x128xi32>
      %158 = vector.shape_cast %157 : vector<1x1x128xi32> to vector<1x128xi32>
      %159 = vector.shape_cast %156 : vector<1x128xi32> to vector<1x1x128xi32>
      tpu.vector_store %arg4[%c0_105, %c5_106, %c0_107], %159 {strides = array<i32>} : memref<1x16x128xi32, #tpu.memory_space<vmem>>, vector<1x1x128xi32>,
      %160 = vector.shape_cast %154 : vector<1x1xf32> to vector<1x1xf32>
      %161 = vector.broadcast %160 : vector<1x1xf32> to vector<1x128xf32>
      %c0_108 = arith.constant 0 : index
      %c5_109 = arith.constant 5 : index
      %c0_110 = arith.constant 0 : index
      %162 = vector.load %arg5[%c0_108, %c5_109, %c0_110] : memref<1x16x128xf32, #tpu.memory_space<vmem>>, vector<1x1x128xf32>
      %163 = vector.shape_cast %162 : vector<1x1x128xf32> to vector<1x128xf32>
      %164 = vector.shape_cast %161 : vector<1x128xf32> to vector<1x1x128xf32>
      tpu.vector_store %arg5[%c0_108, %c5_109, %c0_110], %164 {strides = array<i32>} : memref<1x16x128xf32, #tpu.memory_space<vmem>>, vector<1x1x128xf32>,
      %c6 = arith.constant 6 : index
      %c0_111 = arith.constant 0 : index
      %c0_112 = arith.constant 0 : index
      %165 = vector.load %arg6[%c6, %c0_111, %c0_112] : memref<16x8x128xi32, #tpu.memory_space<vmem>>, vector<1x8x128xi32>
      %166 = vector.shape_cast %165 : vector<1x8x128xi32> to vector<8x128xi32>
      %cst_113 = arith.constant dense<0> : vector<128xi32>
      %167 = vector.multi_reduction <add>, %166, %cst_113 [0] : vector<8x128xi32> to vector<128xi32>
      %168 = vector.shape_cast %167 : vector<128xi32> to vector<1x128xi32>
      %c6_114 = arith.constant 6 : index
      %c0_115 = arith.constant 0 : index
      %c0_116 = arith.constant 0 : index
      %169 = vector.load %arg7[%c6_114, %c0_115, %c0_116] : memref<16x8x128xf32, #tpu.memory_space<vmem>>, vector<1x8x128xf32>
      %170 = vector.shape_cast %169 : vector<1x8x128xf32> to vector<8x128xf32>
      %cst_117 = arith.constant dense<0.000000e+00> : vector<128xf32>
      %171 = vector.multi_reduction <add>, %170, %cst_117 [0] : vector<8x128xf32> to vector<128xf32>
      %172 = vector.shape_cast %171 : vector<128xf32> to vector<1x128xf32>
      %cst_118 = arith.constant dense<0> : vector<1xi32>
      %173 = vector.multi_reduction <add>, %168, %cst_118 [1] : vector<1x128xi32> to vector<1xi32>
      %174 = vector.shape_cast %173 : vector<1xi32> to vector<1x1xi32>
      %cst_119 = arith.constant dense<0.000000e+00> : vector<1xf32>
      %175 = vector.multi_reduction <add>, %172, %cst_119 [1] : vector<1x128xf32> to vector<1xf32>
      %176 = vector.shape_cast %175 : vector<1xf32> to vector<1x1xf32>
      %177 = vector.shape_cast %174 : vector<1x1xi32> to vector<1x1xi32>
      %178 = vector.broadcast %177 : vector<1x1xi32> to vector<1x128xi32>
      %c0_120 = arith.constant 0 : index
      %c6_121 = arith.constant 6 : index
      %c0_122 = arith.constant 0 : index
      %179 = vector.load %arg4[%c0_120, %c6_121, %c0_122] : memref<1x16x128xi32, #tpu.memory_space<vmem>>, vector<1x1x128xi32>
      %180 = vector.shape_cast %179 : vector<1x1x128xi32> to vector<1x128xi32>
      %181 = vector.shape_cast %178 : vector<1x128xi32> to vector<1x1x128xi32>
      tpu.vector_store %arg4[%c0_120, %c6_121, %c0_122], %181 {strides = array<i32>} : memref<1x16x128xi32, #tpu.memory_space<vmem>>, vector<1x1x128xi32>,
      %182 = vector.shape_cast %176 : vector<1x1xf32> to vector<1x1xf32>
      %183 = vector.broadcast %182 : vector<1x1xf32> to vector<1x128xf32>
      %c0_123 = arith.constant 0 : index
      %c6_124 = arith.constant 6 : index
      %c0_125 = arith.constant 0 : index
      %184 = vector.load %arg5[%c0_123, %c6_124, %c0_125] : memref<1x16x128xf32, #tpu.memory_space<vmem>>, vector<1x1x128xf32>
      %185 = vector.shape_cast %184 : vector<1x1x128xf32> to vector<1x128xf32>
      %186 = vector.shape_cast %183 : vector<1x128xf32> to vector<1x1x128xf32>
      tpu.vector_store %arg5[%c0_123, %c6_124, %c0_125], %186 {strides = array<i32>} : memref<1x16x128xf32, #tpu.memory_space<vmem>>, vector<1x1x128xf32>,
      %c7 = arith.constant 7 : index
      %c0_126 = arith.constant 0 : index
      %c0_127 = arith.constant 0 : index
      %187 = vector.load %arg6[%c7, %c0_126, %c0_127] : memref<16x8x128xi32, #tpu.memory_space<vmem>>, vector<1x8x128xi32>
      %188 = vector.shape_cast %187 : vector<1x8x128xi32> to vector<8x128xi32>
      %cst_128 = arith.constant dense<0> : vector<128xi32>
      %189 = vector.multi_reduction <add>, %188, %cst_128 [0] : vector<8x128xi32> to vector<128xi32>
      %190 = vector.shape_cast %189 : vector<128xi32> to vector<1x128xi32>
      %c7_129 = arith.constant 7 : index
      %c0_130 = arith.constant 0 : index
      %c0_131 = arith.constant 0 : index
      %191 = vector.load %arg7[%c7_129, %c0_130, %c0_131] : memref<16x8x128xf32, #tpu.memory_space<vmem>>, vector<1x8x128xf32>
      %192 = vector.shape_cast %191 : vector<1x8x128xf32> to vector<8x128xf32>
      %cst_132 = arith.constant dense<0.000000e+00> : vector<128xf32>
      %193 = vector.multi_reduction <add>, %192, %cst_132 [0] : vector<8x128xf32> to vector<128xf32>
      %194 = vector.shape_cast %193 : vector<128xf32> to vector<1x128xf32>
      %cst_133 = arith.constant dense<0> : vector<1xi32>
      %195 = vector.multi_reduction <add>, %190, %cst_133 [1] : vector<1x128xi32> to vector<1xi32>
      %196 = vector.shape_cast %195 : vector<1xi32> to vector<1x1xi32>
      %cst_134 = arith.constant dense<0.000000e+00> : vector<1xf32>
      %197 = vector.multi_reduction <add>, %194, %cst_134 [1] : vector<1x128xf32> to vector<1xf32>
      %198 = vector.shape_cast %197 : vector<1xf32> to vector<1x1xf32>
      %199 = vector.shape_cast %196 : vector<1x1xi32> to vector<1x1xi32>
      %200 = vector.broadcast %199 : vector<1x1xi32> to vector<1x128xi32>
      %c0_135 = arith.constant 0 : index
      %c7_136 = arith.constant 7 : index
      %c0_137 = arith.constant 0 : index
      %201 = vector.load %arg4[%c0_135, %c7_136, %c0_137] : memref<1x16x128xi32, #tpu.memory_space<vmem>>, vector<1x1x128xi32>
      %202 = vector.shape_cast %201 : vector<1x1x128xi32> to vector<1x128xi32>
      %203 = vector.shape_cast %200 : vector<1x128xi32> to vector<1x1x128xi32>
      tpu.vector_store %arg4[%c0_135, %c7_136, %c0_137], %203 {strides = array<i32>} : memref<1x16x128xi32, #tpu.memory_space<vmem>>, vector<1x1x128xi32>,
      %204 = vector.shape_cast %198 : vector<1x1xf32> to vector<1x1xf32>
      %205 = vector.broadcast %204 : vector<1x1xf32> to vector<1x128xf32>
      %c0_138 = arith.constant 0 : index
      %c7_139 = arith.constant 7 : index
      %c0_140 = arith.constant 0 : index
      %206 = vector.load %arg5[%c0_138, %c7_139, %c0_140] : memref<1x16x128xf32, #tpu.memory_space<vmem>>, vector<1x1x128xf32>
      %207 = vector.shape_cast %206 : vector<1x1x128xf32> to vector<1x128xf32>
      %208 = vector.shape_cast %205 : vector<1x128xf32> to vector<1x1x128xf32>
      tpu.vector_store %arg5[%c0_138, %c7_139, %c0_140], %208 {strides = array<i32>} : memref<1x16x128xf32, #tpu.memory_space<vmem>>, vector<1x1x128xf32>,
      %c8 = arith.constant 8 : index
      %c0_141 = arith.constant 0 : index
      %c0_142 = arith.constant 0 : index
      %209 = vector.load %arg6[%c8, %c0_141, %c0_142] : memref<16x8x128xi32, #tpu.memory_space<vmem>>, vector<1x8x128xi32>
      %210 = vector.shape_cast %209 : vector<1x8x128xi32> to vector<8x128xi32>
      %cst_143 = arith.constant dense<0> : vector<128xi32>
      %211 = vector.multi_reduction <add>, %210, %cst_143 [0] : vector<8x128xi32> to vector<128xi32>
      %212 = vector.shape_cast %211 : vector<128xi32> to vector<1x128xi32>
      %c8_144 = arith.constant 8 : index
      %c0_145 = arith.constant 0 : index
      %c0_146 = arith.constant 0 : index
      %213 = vector.load %arg7[%c8_144, %c0_145, %c0_146] : memref<16x8x128xf32, #tpu.memory_space<vmem>>, vector<1x8x128xf32>
      %214 = vector.shape_cast %213 : vector<1x8x128xf32> to vector<8x128xf32>
      %cst_147 = arith.constant dense<0.000000e+00> : vector<128xf32>
      %215 = vector.multi_reduction <add>, %214, %cst_147 [0] : vector<8x128xf32> to vector<128xf32>
      %216 = vector.shape_cast %215 : vector<128xf32> to vector<1x128xf32>
      %cst_148 = arith.constant dense<0> : vector<1xi32>
      %217 = vector.multi_reduction <add>, %212, %cst_148 [1] : vector<1x128xi32> to vector<1xi32>
      %218 = vector.shape_cast %217 : vector<1xi32> to vector<1x1xi32>
      %cst_149 = arith.constant dense<0.000000e+00> : vector<1xf32>
      %219 = vector.multi_reduction <add>, %216, %cst_149 [1] : vector<1x128xf32> to vector<1xf32>
      %220 = vector.shape_cast %219 : vector<1xf32> to vector<1x1xf32>
      %221 = vector.shape_cast %218 : vector<1x1xi32> to vector<1x1xi32>
      %222 = vector.broadcast %221 : vector<1x1xi32> to vector<1x128xi32>
      %c0_150 = arith.constant 0 : index
      %c8_151 = arith.constant 8 : index
      %c0_152 = arith.constant 0 : index
      %223 = vector.load %arg4[%c0_150, %c8_151, %c0_152] : memref<1x16x128xi32, #tpu.memory_space<vmem>>, vector<1x1x128xi32>
      %224 = vector.shape_cast %223 : vector<1x1x128xi32> to vector<1x128xi32>
      %225 = vector.shape_cast %222 : vector<1x128xi32> to vector<1x1x128xi32>
      tpu.vector_store %arg4[%c0_150, %c8_151, %c0_152], %225 {strides = array<i32>} : memref<1x16x128xi32, #tpu.memory_space<vmem>>, vector<1x1x128xi32>,
      %226 = vector.shape_cast %220 : vector<1x1xf32> to vector<1x1xf32>
      %227 = vector.broadcast %226 : vector<1x1xf32> to vector<1x128xf32>
      %c0_153 = arith.constant 0 : index
      %c8_154 = arith.constant 8 : index
      %c0_155 = arith.constant 0 : index
      %228 = vector.load %arg5[%c0_153, %c8_154, %c0_155] : memref<1x16x128xf32, #tpu.memory_space<vmem>>, vector<1x1x128xf32>
      %229 = vector.shape_cast %228 : vector<1x1x128xf32> to vector<1x128xf32>
      %230 = vector.shape_cast %227 : vector<1x128xf32> to vector<1x1x128xf32>
      tpu.vector_store %arg5[%c0_153, %c8_154, %c0_155], %230 {strides = array<i32>} : memref<1x16x128xf32, #tpu.memory_space<vmem>>, vector<1x1x128xf32>,
      %c9 = arith.constant 9 : index
      %c0_156 = arith.constant 0 : index
      %c0_157 = arith.constant 0 : index
      %231 = vector.load %arg6[%c9, %c0_156, %c0_157] : memref<16x8x128xi32, #tpu.memory_space<vmem>>, vector<1x8x128xi32>
      %232 = vector.shape_cast %231 : vector<1x8x128xi32> to vector<8x128xi32>
      %cst_158 = arith.constant dense<0> : vector<128xi32>
      %233 = vector.multi_reduction <add>, %232, %cst_158 [0] : vector<8x128xi32> to vector<128xi32>
      %234 = vector.shape_cast %233 : vector<128xi32> to vector<1x128xi32>
      %c9_159 = arith.constant 9 : index
      %c0_160 = arith.constant 0 : index
      %c0_161 = arith.constant 0 : index
      %235 = vector.load %arg7[%c9_159, %c0_160, %c0_161] : memref<16x8x128xf32, #tpu.memory_space<vmem>>, vector<1x8x128xf32>
      %236 = vector.shape_cast %235 : vector<1x8x128xf32> to vector<8x128xf32>
      %cst_162 = arith.constant dense<0.000000e+00> : vector<128xf32>
      %237 = vector.multi_reduction <add>, %236, %cst_162 [0] : vector<8x128xf32> to vector<128xf32>
      %238 = vector.shape_cast %237 : vector<128xf32> to vector<1x128xf32>
      %cst_163 = arith.constant dense<0> : vector<1xi32>
      %239 = vector.multi_reduction <add>, %234, %cst_163 [1] : vector<1x128xi32> to vector<1xi32>
      %240 = vector.shape_cast %239 : vector<1xi32> to vector<1x1xi32>
      %cst_164 = arith.constant dense<0.000000e+00> : vector<1xf32>
      %241 = vector.multi_reduction <add>, %238, %cst_164 [1] : vector<1x128xf32> to vector<1xf32>
      %242 = vector.shape_cast %241 : vector<1xf32> to vector<1x1xf32>
      %243 = vector.shape_cast %240 : vector<1x1xi32> to vector<1x1xi32>
      %244 = vector.broadcast %243 : vector<1x1xi32> to vector<1x128xi32>
      %c0_165 = arith.constant 0 : index
      %c9_166 = arith.constant 9 : index
      %c0_167 = arith.constant 0 : index
      %245 = vector.load %arg4[%c0_165, %c9_166, %c0_167] : memref<1x16x128xi32, #tpu.memory_space<vmem>>, vector<1x1x128xi32>
      %246 = vector.shape_cast %245 : vector<1x1x128xi32> to vector<1x128xi32>
      %247 = vector.shape_cast %244 : vector<1x128xi32> to vector<1x1x128xi32>
      tpu.vector_store %arg4[%c0_165, %c9_166, %c0_167], %247 {strides = array<i32>} : memref<1x16x128xi32, #tpu.memory_space<vmem>>, vector<1x1x128xi32>,
      %248 = vector.shape_cast %242 : vector<1x1xf32> to vector<1x1xf32>
      %249 = vector.broadcast %248 : vector<1x1xf32> to vector<1x128xf32>
      %c0_168 = arith.constant 0 : index
      %c9_169 = arith.constant 9 : index
      %c0_170 = arith.constant 0 : index
      %250 = vector.load %arg5[%c0_168, %c9_169, %c0_170] : memref<1x16x128xf32, #tpu.memory_space<vmem>>, vector<1x1x128xf32>
      %251 = vector.shape_cast %250 : vector<1x1x128xf32> to vector<1x128xf32>
      %252 = vector.shape_cast %249 : vector<1x128xf32> to vector<1x1x128xf32>
      tpu.vector_store %arg5[%c0_168, %c9_169, %c0_170], %252 {strides = array<i32>} : memref<1x16x128xf32, #tpu.memory_space<vmem>>, vector<1x1x128xf32>,
      %c10 = arith.constant 10 : index
      %c0_171 = arith.constant 0 : index
      %c0_172 = arith.constant 0 : index
      %253 = vector.load %arg6[%c10, %c0_171, %c0_172] : memref<16x8x128xi32, #tpu.memory_space<vmem>>, vector<1x8x128xi32>
      %254 = vector.shape_cast %253 : vector<1x8x128xi32> to vector<8x128xi32>
      %cst_173 = arith.constant dense<0> : vector<128xi32>
      %255 = vector.multi_reduction <add>, %254, %cst_173 [0] : vector<8x128xi32> to vector<128xi32>
      %256 = vector.shape_cast %255 : vector<128xi32> to vector<1x128xi32>
      %c10_174 = arith.constant 10 : index
      %c0_175 = arith.constant 0 : index
      %c0_176 = arith.constant 0 : index
      %257 = vector.load %arg7[%c10_174, %c0_175, %c0_176] : memref<16x8x128xf32, #tpu.memory_space<vmem>>, vector<1x8x128xf32>
      %258 = vector.shape_cast %257 : vector<1x8x128xf32> to vector<8x128xf32>
      %cst_177 = arith.constant dense<0.000000e+00> : vector<128xf32>
      %259 = vector.multi_reduction <add>, %258, %cst_177 [0] : vector<8x128xf32> to vector<128xf32>
      %260 = vector.shape_cast %259 : vector<128xf32> to vector<1x128xf32>
      %cst_178 = arith.constant dense<0> : vector<1xi32>
      %261 = vector.multi_reduction <add>, %256, %cst_178 [1] : vector<1x128xi32> to vector<1xi32>
      %262 = vector.shape_cast %261 : vector<1xi32> to vector<1x1xi32>
      %cst_179 = arith.constant dense<0.000000e+00> : vector<1xf32>
      %263 = vector.multi_reduction <add>, %260, %cst_179 [1] : vector<1x128xf32> to vector<1xf32>
      %264 = vector.shape_cast %263 : vector<1xf32> to vector<1x1xf32>
      %265 = vector.shape_cast %262 : vector<1x1xi32> to vector<1x1xi32>
      %266 = vector.broadcast %265 : vector<1x1xi32> to vector<1x128xi32>
      %c0_180 = arith.constant 0 : index
      %c10_181 = arith.constant 10 : index
      %c0_182 = arith.constant 0 : index
      %267 = vector.load %arg4[%c0_180, %c10_181, %c0_182] : memref<1x16x128xi32, #tpu.memory_space<vmem>>, vector<1x1x128xi32>
      %268 = vector.shape_cast %267 : vector<1x1x128xi32> to vector<1x128xi32>
      %269 = vector.shape_cast %266 : vector<1x128xi32> to vector<1x1x128xi32>
      tpu.vector_store %arg4[%c0_180, %c10_181, %c0_182], %269 {strides = array<i32>} : memref<1x16x128xi32, #tpu.memory_space<vmem>>, vector<1x1x128xi32>,
      %270 = vector.shape_cast %264 : vector<1x1xf32> to vector<1x1xf32>
      %271 = vector.broadcast %270 : vector<1x1xf32> to vector<1x128xf32>
      %c0_183 = arith.constant 0 : index
      %c10_184 = arith.constant 10 : index
      %c0_185 = arith.constant 0 : index
      %272 = vector.load %arg5[%c0_183, %c10_184, %c0_185] : memref<1x16x128xf32, #tpu.memory_space<vmem>>, vector<1x1x128xf32>
      %273 = vector.shape_cast %272 : vector<1x1x128xf32> to vector<1x128xf32>
      %274 = vector.shape_cast %271 : vector<1x128xf32> to vector<1x1x128xf32>
      tpu.vector_store %arg5[%c0_183, %c10_184, %c0_185], %274 {strides = array<i32>} : memref<1x16x128xf32, #tpu.memory_space<vmem>>, vector<1x1x128xf32>,
    } else {
    }
    return
  }
  func.func @transform_0(%arg0: i32, %arg1: i32) -> (i32, i32) {
    %c1_i32 = arith.constant 1 : i32
    %0 = arith.muli %arg0, %c1_i32 : i32
    %1 = arith.addi %0, %arg1 : i32
    %c0_i32 = arith.constant 0 : i32
    %2 = arith.minsi %1, %c0_i32 : i32
    %c0_i32_0 = arith.constant 0 : i32
    %c0_i32_1 = arith.constant 0 : i32
    return %2, %c0_i32_0 : i32, i32
  }
  func.func @transform_1(%arg0: i32, %arg1: i32) -> (i32, i32) {
    %c1_i32 = arith.constant 1 : i32
    %0 = arith.muli %arg0, %c1_i32 : i32
    %1 = arith.addi %0, %arg1 : i32
    %c0_i32 = arith.constant 0 : i32
    %2 = arith.minsi %1, %c0_i32 : i32
    %c0_i32_0 = arith.constant 0 : i32
    %c0_i32_1 = arith.constant 0 : i32
    return %2, %c0_i32_0 : i32, i32
  }
  func.func @transform_2(%arg0: i32, %arg1: i32) -> (i32, i32, i32) {
    %c0_i32 = arith.constant 0 : i32
    %c0_i32_0 = arith.constant 0 : i32
    %c0_i32_1 = arith.constant 0 : i32
    return %arg0, %c0_i32, %c0_i32_0 : i32, i32, i32
  }
  func.func @transform_3(%arg0: i32, %arg1: i32) -> (i32, i32, i32) {
    %c0_i32 = arith.constant 0 : i32
    %c0_i32_0 = arith.constant 0 : i32
    %c0_i32_1 = arith.constant 0 : i32
    return %arg0, %c0_i32, %c0_i32_0 : i32, i32, i32
  }
}

</mosaic_0001>

<bundles_post_ra>
// kernel: _ghmc_impl.1
= control target key start
LH: loop header
LB: loop body
LE: loop exit
PB: predicated region body
PF: predicated region fallthrough
CT: control target
= control target key end

     0   :  { %v292_v0 = vlaneseq  ;;  %v830_v1 = vmov 1   ;;  %v831_v18 = vmov 0   ;;  %s1054_s0 = inlined_call_operand.vmem [shape: f32[2,128], index: 0, kind: input, shape index: {}]   ;;  %s1055_s1 = inlined_call_operand.vmem [shape: f32[2,128], index: 1, kind: input, shape index: {}]   ;;  %s1056_s2 = inlined_call_operand.vmem [shape: s32[1,16,128], index: 2, kind: output, shape index: {0}]   ;;  %s1057_s3 = inlined_call_operand.vmem [shape: f32[1,16,128], index: 3, kind: output, shape index: {1}]  }
   0x1   :  { %v454_v2 = vrot.slane %v830_v1, 4  ;;  %v135_v3 = vld [vmem:[%s1054_s0] sm:$0xff]  ;;  %449 = vst [vmem:[%s1056_s2] sm:$0xff] %v831_v18  ;;  %450 = vst [vmem:[%s1056_s2 + $0x8] sm:$0xff] %v831_v18 }
   0x2   :  { %v136_v4 = vld [vmem:[%s1055_s1] sm:$0xff]  ;;  %v859_v5 = vshrl.u32 %v292_v0, 7 }
   0x3   :  { %v455_v6 = vadd.s32 1, %v454_v2 }
   0x4   :  { %vm296_vm0 = vcmp.lt.s32.totalorder %v859_v5, 2 }
   0x5   :  { %v456_v7 = vrot.slane %v455_v6, 2  ;;  %v864_v8 = vsel %vm296_vm0, %v135_v3, 2.0  ;;  %v868_v9 = vsel %vm296_vm0, %v136_v4, 0.0 }
   0x6   :  { %v299_v10 = vsub.f32 %v864_v8, %v868_v9  ;;  %v304_v11 = vand.u32 2147483647, %v864_v8 }
   0x7   :  { %v457_v12 = vadd.s32 %v456_v7, %v455_v6 }
   0x8   :  { %v873_v13 = vand.u32 2147483647, %v299_v10  ;;  %v305_v14 = vsub.f32 0.0, %v304_v11 }
   0x9   :  { %v458_v15 = vrot.slane %v457_v12, 1 }
   0xa   :  { %v306_v16 = vmul.f32 1.442695, %v305_v14  ;;  %vm338_vm1 = vcmp.ge.f32.partialorder %v873_v13, 0.2  ;;  %vm326_vm2 = vcmp.ge.f32.partialorder %v873_v13, 0.1 }
   0xb   :  { %v459_v17 = vadd.s32 %v458_v15, %v457_v12  ;;  %v341_v19 = vsel %vm338_vm1, 1, %v831_v18  ;;  %v329_v20 = vsel %vm326_vm2, 1, %v831_v18  ;;  %vm350_vm3 = vcmp.ge.f32.partialorder %v873_v13, 0.3 }
   0xc   :  { %826 = vpow2.f32 %v306_v16  ;;  %v517_v21 = vrot.slane %v341_v19, 4  ;;  %v485_v22 = vrot.slane %v329_v20, 4  ;;  %v353_v23 = vsel %vm350_vm3, 1, %v831_v18 }
   0xd   :  { %v468_v24 = vshrl.u32 %v459_v17, 16  ;;  %v467_v25 = vand.u32 65535, %v459_v17  ;;  %v549_v26 = vrot.slane %v353_v23, 4  ;;  %vm362_vm4 = vcmp.ge.f32.partialorder %v873_v13, 0.4 }
   0xe   :  { %v518_v27 = vadd.s32 %v517_v21, %v341_v19  ;;  %v486_v28 = vadd.s32 %v485_v22, %v329_v20  ;;  %v365_v29 = vsel %vm362_vm4, 1, %v831_v18  ;;  %vm374_vm5 = vcmp.ge.f32.partialorder %v873_v13, 0.5 }
   0xf   :  { %v470_v30 = vcvt.s32.f32 %v468_v24  ;;  %v469_v31 = vcvt.s32.f32 %v467_v25  ;;  %v550_v32 = vadd.s32 %v549_v26, %v353_v23  ;;  %v581_v33 = vrot.slane %v365_v29, 4 }
  0x10   :  { %v519_v34 = vrot.slane %v518_v27, 2  ;;  %v487_v35 = vrot.slane %v486_v28, 2  ;;  %v377_v36 = vsel %vm374_vm5, 1, %v831_v18  ;;  %vm386_vm6 = vcmp.ge.f32.partialorder %v873_v13, 0.6 }
  0x11   :  { %473 = vadd.xlane.f32.xlu0 %v470_v30  ;;  %471 = vadd.xlane.f32.xlu1 %v469_v31  ;;  %v551_v37 = vrot.slane %v550_v32, 2  ;;  %v582_v38 = vadd.s32 %v581_v33, %v365_v29  ;;  %v613_v39 = vrot.slane %v377_v36, 4  ;;  %v389_v40 = vsel %vm386_vm6, 1, %v831_v18 }
  0x12   :  { %v520_v41 = vadd.s32 %v519_v34, %v518_v27  ;;  %v488_v42 = vadd.s32 %v487_v35, %v486_v28  ;;  %v645_v43 = vrot.slane %v389_v40, 4  ;;  %vm398_vm7 = vcmp.ge.f32.partialorder %v873_v13, 0.7 }
  0x13   :  { %v552_v44 = vadd.s32 %v551_v37, %v550_v32  ;;  %v583_v45 = vrot.slane %v582_v38, 2  ;;  %v614_v46 = vadd.s32 %v613_v39, %v377_v36  ;;  %v401_v47 = vsel %vm398_vm7, 1, %v831_v18 }
  0x14   :  { %v521_v48 = vrot.slane %v520_v41, 1  ;;  %v489_v49 = vrot.slane %v488_v42, 1  ;;  %v646_v50 = vadd.s32 %v645_v43, %v389_v40  ;;  %v677_v51 = vrot.slane %v401_v47, 4 }
  0x15   :  { %v553_v52 = vrot.slane %v552_v44, 1  ;;  %v584_v53 = vadd.s32 %v583_v45, %v582_v38  ;;  %v615_v54 = vrot.slane %v614_v46, 2  ;;  %vm410_vm8 = vcmp.ge.f32.partialorder %v873_v13, 0.8 }
  0x16   :  { %v904_v55 = vpop.eup %826  ;;  %v906_v56 = vadd.s32 %v521_v48, %v520_v41  ;;  %v908_v57 = vadd.s32 %v489_v49, %v488_v42  ;;  %v647_v58 = vrot.slane %v646_v50, 2  ;;  %v678_v59 = vadd.s32 %v677_v51, %v401_v47 }
  0x17   :  { %v910_v60 = vadd.s32 %v553_v52, %v552_v44  ;;  %v585_v61 = vrot.slane %v584_v53, 1  ;;  %v616_v62 = vadd.s32 %v615_v54, %v614_v46  ;;  %v413_v63 = vsel %vm410_vm8, 1, %v831_v18 }
  0x18   :  { %v532_v0 = vshrl.u32 %v906_v56, 16  ;;  %v500_v1 = vshrl.u32 %v908_v57, 16  ;;  %v648_v2 = vadd.s32 %v647_v58, %v646_v50  ;;  %v679_v3 = vrot.slane %v678_v59, 2 }
  0x19   :  { %v564_v4 = vshrl.u32 %v910_v60, 16  ;;  %v918_v6 = vadd.s32 %v585_v61, %v584_v53  ;;  %v617_v7 = vrot.slane %v616_v62, 1  ;;  %v709_v10 = vrot.slane %v413_v63, 4 }
  0x1a   :  { %v534_v11 = vcvt.s32.f32 %v532_v0  ;;  %v502_v12 = vcvt.s32.f32 %v500_v1  ;;  %v649_v14 = vrot.slane %v648_v2, 1  ;;  %v680_v15 = vadd.s32 %v679_v3, %v678_v59 }
  0x1b   :  { %v566_v16 = vcvt.s32.f32 %v564_v4  ;;  %v596_v17 = vshrl.u32 %v918_v6, 16  ;;  %v921_v19 = vadd.s32 %v617_v7, %v616_v62  ;;  %v710_v20 = vadd.s32 %v709_v10, %v413_v63 }
  0x1c   :  { %537 = vadd.xlane.f32.xlu1 %v534_v11  ;;  %505 = vadd.xlane.f32.xlu0 %v502_v12  ;;  %v923_v21 = vadd.s32 %v649_v14, %v648_v2  ;;  %v681_v22 = vrot.slane %v680_v15, 1  ;;  %vm422_vm9 = vcmp.ge.f32.partialorder %v873_v13, 0.9  ;;  %vm434_vm10 = vcmp.ge.f32.partialorder %v873_v13, 1.000001 }
  0x1d   :  { %v598_v23 = vcvt.s32.f32 %v596_v17  ;;  %v628_v24 = vshrl.u32 %v921_v19, 16  ;;  %v711_v25 = vrot.slane %v710_v20, 2  ;;  %v425_v26 = vsel %vm422_vm9, 1, %v831_v18 }
  0x1e   :  { %v660_v27 = vshrl.u32 %v923_v21, 16  ;;  %v932_v28 = vadd.s32 %v681_v22, %v680_v15  ;;  %v741_v29 = vrot.slane %v425_v26, 4  ;;  %v437_v30 = vsel %vm434_vm10, 1, %v831_v18 }
  0x1f   :  { %v712_v31 = vadd.s32 %v711_v25, %v710_v20  ;;  %v773_v32 = vrot.slane %v437_v30, 4  ;;  %v630_v33 = vcvt.s32.f32 %v628_v24  ;;  %v308_v47 = vadd.f32 1.0, %v904_v55 }
  0x20   :  { %569 = vadd.xlane.f32.xlu1 %v566_v16  ;;  %601 = vadd.xlane.f32.xlu0 %v598_v23  ;;  %v662_v34 = vcvt.s32.f32 %v660_v27  ;;  %v692_v35 = vshrl.u32 %v932_v28, 16  ;;  %v742_v36 = vadd.s32 %v741_v29, %v425_v26  ;;  %v311_v18 = vmul.f32 -0.5, %v904_v55 }
  0x21   :  { %v713_v37 = vrot.slane %v712_v31, 1  ;;  %v774_v38 = vadd.s32 %v773_v32, %v437_v30  ;;  %828 = vlog2.f32 %v308_v47  ;;  %v531_v53 = vand.u32 65535, %v906_v56 }
  0x22   :  { %v743_v39 = vrot.slane %v742_v36, 2  ;;  %v694_v42 = vcvt.s32.f32 %v692_v35  ;;  %v499_v58 = vand.u32 65535, %v908_v57  ;;  %v301_v62 = vmax.f32 %v864_v8, 0.0 }
  0x23   :  { %v714_v40 = vadd.s32 %v713_v37, %v712_v31  ;;  %v775_v41 = vrot.slane %v774_v38, 2  ;;  %v312_v63 = vadd.f32 1.0, %v311_v18  ;;  %v533_v0 = vcvt.s32.f32 %v531_v53 }
  0x24   :  { %633 = vadd.xlane.f32.xlu1 %v630_v33  ;;  %665 = vadd.xlane.f32.xlu0 %v662_v34  ;;  %v744_v43 = vadd.s32 %v743_v39, %v742_v36  ;;  %v595_v1 = vand.u32 65535, %v918_v6  ;;  %v302_v2 = vmul.f32 %v868_v9, %v864_v8  ;;  %v314_v3 = vand.u32 2147483647, %v904_v55 }
  0x25   :  { %v724_v44 = vshrl.u32 %v714_v40, 16  ;;  %v776_v45 = vadd.s32 %v775_v41, %v774_v38  ;;  %v501_v4 = vcvt.s32.f32 %v499_v58  ;;  %v563_v56 = vand.u32 65535, %v910_v60 }
  0x26   :  { %v745_v46 = vrot.slane %v744_v43, 1  ;;  %v313_v57 = vmul.f32 %v904_v55, %v312_v63  ;;  %v597_v10 = vcvt.s32.f32 %v595_v1  ;;  %v659_v11 = vand.u32 65535, %v923_v21 }
  0x27   :  { %v726_v48 = vcvt.s32.f32 %v724_v44  ;;  %v777_v49 = vrot.slane %v776_v45, 1  ;;  %v303_v12 = vsub.f32 %v301_v62, %v302_v2  ;;  %vm315_vm11 = vcmp.lt.f32.partialorder %v314_v3, 0.0004427343 }
  0x28   :  { %697 = vadd.xlane.f32.xlu1 %v694_v42  ;;  %v746_v50 = vadd.s32 %v745_v46, %v744_v43  ;;  %v565_v6 = vcvt.s32.f32 %v563_v56  ;;  %v627_v14 = vand.u32 65535, %v921_v19  ;;  %v691_v8 = vand.u32 65535, %v932_v28 }
  0x29   :  { %729 = vadd.xlane.f32.xlu0 %v726_v48  ;;  %v778_v51 = vadd.s32 %v777_v49, %v776_v45  ;;  %v723_v15 = vand.u32 65535, %v714_v40  ;;  %v661_v55 = vcvt.s32.f32 %v659_v11 }
  0x2a   :  { %v756_v52 = vshrl.u32 %v746_v50, 16  ;;  %v755_v17 = vand.u32 65535, %v746_v50  ;;  %v629_v22 = vcvt.s32.f32 %v627_v14  ;;  %v693_v23 = vcvt.s32.f32 %v691_v8 }
  0x2b   :  { %v788_v54 = vshrl.u32 %v778_v51, 16  ;;  %v829_v7 = vpop.eup %828  ;;  %v787_v16 = vand.u32 65535, %v778_v51  ;;  %v725_v21 = vcvt.s32.f32 %v723_v15 }
  0x2c   :  { %v758_v59 = vcvt.s32.f32 %v756_v52  ;;  %v310_v9 = vmul.f32 0.6931472, %v829_v7  ;;  %v757_v25 = vcvt.s32.f32 %v755_v17 }
  0x2d   :  { %v790_v61 = vcvt.s32.f32 %v788_v54  ;;  %v789_v24 = vcvt.s32.f32 %v787_v16 }
  0x2e   :  { %761 = vadd.xlane.f32.xlu1 %v758_v59  ;;  %v316_v60 = vsel %vm315_vm11, %v313_v57, %v310_v9 }
  0x2f   :  { %793 = vadd.xlane.f32.xlu0 %v790_v61  ;;  %v317_v20 = vadd.f32 %v316_v60, %v303_v12 }
  0x31   :  { %v318_v26 = vsel %vm296_vm0, %v317_v20, 0.0 }
  0x32   :  { %535 = vadd.xlane.f32.xlu1 %v533_v0  ;;  %v461_v19 = vrot.slane %v318_v26, 4  ;;  %v334_v27 = vsel %vm326_vm2, %v318_v26, 0.0  ;;  %v346_v28 = vsel %vm338_vm1, %v318_v26, 0.0  ;;  %v358_v29 = vsel %vm350_vm3, %v318_v26, 0.0 }
  0x33   :  { %503 = vadd.xlane.f32.xlu0 %v501_v4  ;;  %v493_v30 = vrot.slane %v334_v27, 4  ;;  %v525_v31 = vrot.slane %v346_v28, 4  ;;  %v557_v32 = vrot.slane %v358_v29, 4  ;;  %v370_v33 = vsel %vm362_vm4, %v318_v26, 0.0 }
  0x34   :  { %v462_v5 = vadd.f32 %v461_v19, %v318_v26  ;;  %v589_v34 = vrot.slane %v370_v33, 4  ;;  %v382_v35 = vsel %vm374_vm5, %v318_v26, 0.0  ;;  %v394_v36 = vsel %vm386_vm6, %v318_v26, 0.0 }
  0x35   :  { %v494_v37 = vadd.f32 %v493_v30, %v334_v27  ;;  %v526_v38 = vadd.f32 %v525_v31, %v346_v28  ;;  %v558_v39 = vadd.f32 %v557_v32, %v358_v29  ;;  %v621_v40 = vrot.slane %v382_v35, 4 }
  0x36   :  { %599 = vadd.xlane.f32.xlu1 %v597_v10  ;;  %v463_v41 = vrot.slane %v462_v5, 2  ;;  %v590_v42 = vadd.f32 %v589_v34, %v370_v33  ;;  %v653_v43 = vrot.slane %v394_v36, 4  ;;  %v406_v44 = vsel %vm398_vm7, %v318_v26, 0.0 }
  0x37   :  { %567 = vadd.xlane.f32.xlu0 %v565_v6  ;;  %v495_v45 = vrot.slane %v494_v37, 2  ;;  %v527_v46 = vrot.slane %v526_v38, 2  ;;  %v559_v47 = vrot.slane %v558_v39, 2  ;;  %v622_v48 = vadd.f32 %v621_v40, %v382_v35 }
  0x38   :  { %v464_v49 = vadd.f32 %v463_v41, %v462_v5  ;;  %v591_v50 = vrot.slane %v590_v42, 2  ;;  %v654_v51 = vadd.f32 %v653_v43, %v394_v36  ;;  %v685_v18 = vrot.slane %v406_v44, 4 }
  0x39   :  { %v496_v52 = vadd.f32 %v495_v45, %v494_v37  ;;  %v528_v53 = vadd.f32 %v527_v46, %v526_v38  ;;  %v560_v54 = vadd.f32 %v559_v47, %v558_v39  ;;  %v623_v58 = vrot.slane %v622_v48, 2 }
  0x3a   :  { %663 = vadd.xlane.f32.xlu1 %v661_v55  ;;  %v465_v59 = vrot.slane %v464_v49, 1  ;;  %v592_v61 = vadd.f32 %v591_v50, %v590_v42  ;;  %v686_v62 = vadd.f32 %v685_v18, %v406_v44  ;;  %v655_v4 = vrot.slane %v654_v51, 2 }
  0x3b   :  { %631 = vadd.xlane.f32.xlu0 %v629_v22  ;;  %v497_v63 = vrot.slane %v496_v52, 1  ;;  %v561_v0 = vrot.slane %v560_v54, 1  ;;  %v624_v1 = vadd.f32 %v623_v58, %v622_v48  ;;  %v529_v3 = vrot.slane %v528_v53, 1 }
  0x3c   :  { %v466_v2 = vadd.f32 %v465_v59, %v464_v49  ;;  %v687_v56 = vrot.slane %v686_v62, 2  ;;  %v593_v10 = vrot.slane %v592_v61, 1  ;;  %v418_v12 = vsel %vm410_vm8, %v318_v26, 0.0 }
  0x3d   :  { %v498_v57 = vadd.f32 %v497_v63, %v496_v52  ;;  %v562_v7 = vadd.f32 %v561_v0, %v560_v54  ;;  %v625_v11 = vrot.slane %v624_v1, 1  ;;  %v717_v14 = vrot.slane %v418_v12, 4 }
  0x3e   :  { %727 = vadd.xlane.f32.xlu1 %v725_v21  ;;  %v688_v6 = vadd.f32 %v687_v56, %v686_v62  ;;  %v430_v8 = vsel %vm422_vm9, %v318_v26, 0.0  ;;  %v442_v9 = vsel %vm434_vm10, %v318_v26, 0.0  ;;  %v530_v15 = vadd.f32 %v529_v3, %v528_v53 }
  0x3f   :  { %695 = vadd.xlane.f32.xlu0 %v693_v23  ;;  %v656_v16 = vadd.f32 %v655_v4, %v654_v51  ;;  %v749_v17 = vrot.slane %v430_v8, 4  ;;  %v781_v60 = vrot.slane %v442_v9, 4  ;;  %v718_v55 = vadd.f32 %v717_v14, %v418_v12 }
  0x40   :  { %v626_v23 = vadd.f32 %v625_v11, %v624_v1  ;;  %v689_v21 = vrot.slane %v688_v6, 1  ;;  %v832_v36 = vmov 0.0  }
  0x41   :  { %v750_v20 = vadd.f32 %v749_v17, %v430_v8  ;;  %v782_v22 = vadd.f32 %v781_v60, %v442_v9  ;;  %v657_v19 = vrot.slane %v656_v16, 1  ;;  %451 = vst [vmem:[%s1057_s3] sm:$0xff] %v832_v36  ;;  %452 = vst [vmem:[%s1057_s3 + $0x8] sm:$0xff] %v832_v36 }
  0x42   :  { %791 = vadd.xlane.f32.xlu1 %v789_v24  ;;  %v719_v24 = vrot.slane %v718_v55, 2  ;;  %v690_v26 = vadd.f32 %v689_v21, %v688_v6 }
  0x43   :  { %759 = vadd.xlane.f32.xlu0 %v757_v25  ;;  %v594_v25 = vadd.f32 %v593_v10, %v592_v61  ;;  %v751_v27 = vrot.slane %v750_v20, 2  ;;  %v783_v28 = vrot.slane %v782_v22, 2  ;;  %v658_v30 = vadd.f32 %v657_v19, %v656_v16 }
  0x44   :  { %v720_v29 = vadd.f32 %v719_v24, %v718_v55 }
  0x45   :  { %v752_v13 = vadd.f32 %v751_v27, %v750_v20  ;;  %v784_v33 = vadd.f32 %v783_v28, %v782_v22 }
  0x46   :  { %511 = vadd.xlane.f32.xlu1 %v498_v57  ;;  %v721_v31 = vrot.slane %v720_v29, 1 }
  0x47   :  { %479 = vadd.xlane.f32.xlu0 %v466_v2  ;;  %v753_v32 = vrot.slane %v752_v13, 1  ;;  %v785_v35 = vrot.slane %v784_v33, 1 }
  0x48   :  { %v722_v34 = vadd.f32 %v721_v31, %v720_v29 }
  0x49   :  { %v754_v5 = vadd.f32 %v753_v32, %v752_v13  ;;  %v786_v37 = vadd.f32 %v785_v35, %v784_v33 }
  0x4a   :  { %575 = vadd.xlane.f32.xlu1 %v562_v7 }
  0x4b   :  { %543 = vadd.xlane.f32.xlu0 %v530_v15 }
  0x4e   :  { %639 = vadd.xlane.f32.xlu1 %v626_v23 }
  0x4f   :  { %607 = vadd.xlane.f32.xlu0 %v594_v25 }
  0x52   :  { %703 = vadd.xlane.f32.xlu1 %v690_v26 }
  0x53   :  { %671 = vadd.xlane.f32.xlu0 %v658_v30 }
  0x56   :  { %767 = vadd.xlane.f32.xlu1 %v754_v5 }
  0x57   :  { %735 = vadd.xlane.f32.xlu0 %v722_v34 }
  0x5b   :  { %799 = vadd.xlane.f32.xlu0 %v786_v37 }
  0x9e   :  { %v474_v38 = vpop.xlane.xlu0 %473  ;;  %v472_v39 = vpop.xlane.xlu1 %471 }
  0x9f   :  { %v476_v40 = vcvt.f32.s32 %v474_v38  ;;  %v475_v41 = vcvt.f32.s32 %v472_v39 }
  0xa1   :  { %v477_v42 = vshll.u32 %v476_v40, 16 }
  0xa3   :  { %v478_v43 = vadd.s32 %v477_v42, %v475_v41 }
  0xa5   :  { %481 = vst [vmem:[%s1056_s2] sm:$0x1] %v478_v43 }
  0xa9   :  { %v538_v44 = vpop.xlane.xlu1 %537  ;;  %v506_v45 = vpop.xlane.xlu0 %505 }
  0xaa   :  { %v540_v52 = vcvt.f32.s32 %v538_v44  ;;  %v508_v54 = vcvt.f32.s32 %v506_v45 }
  0xac   :  { %v541_v59 = vshll.u32 %v540_v52, 16  ;;  %v509_v0 = vshll.u32 %v508_v54, 16 }
  0xad   :  { %v570_v46 = vpop.xlane.xlu1 %569  ;;  %v602_v47 = vpop.xlane.xlu0 %601 }
  0xae   :  { %v604_v61 = vcvt.f32.s32 %v602_v47  ;;  %v572_v1 = vcvt.f32.s32 %v570_v46 }
  0xb0   :  { %v605_v57 = vshll.u32 %v604_v61, 16  ;;  %v573_v12 = vshll.u32 %v572_v1, 16 }
  0xb1   :  { %v634_v48 = vpop.xlane.xlu1 %633  ;;  %v666_v49 = vpop.xlane.xlu0 %665 }
  0xb2   :  { %v668_v7 = vcvt.f32.s32 %v666_v49  ;;  %v636_v6 = vcvt.f32.s32 %v634_v48 }
  0xb4   :  { %v669_v16 = vshll.u32 %v668_v7, 16  ;;  %v637_v20 = vshll.u32 %v636_v6, 16 }
  0xb5   :  { %v698_v50 = vpop.xlane.xlu1 %697 }
  0xb6   :  { %v730_v51 = vpop.xlane.xlu0 %729  ;;  %v700_v22 = vcvt.f32.s32 %v698_v50 }
  0xb7   :  { %v732_v17 = vcvt.f32.s32 %v730_v51 }
  0xb8   :  { %v701_v13 = vshll.u32 %v700_v22, 16 }
  0xb9   :  { %v733_v19 = vshll.u32 %v732_v17, 16 }
  0xbb   :  { %v762_v18 = vpop.xlane.xlu1 %761 }
  0xbc   :  { %v794_v53 = vpop.xlane.xlu0 %793  ;;  %v764_v26 = vcvt.f32.s32 %v762_v18 }
  0xbd   :  { %v796_v27 = vcvt.f32.s32 %v794_v53 }
  0xbe   :  { %v765_v36 = vshll.u32 %v764_v26, 16 }
  0xbf   :  { %v536_v58 = vpop.xlane.xlu1 %535  ;;  %v797_v5 = vshll.u32 %v796_v27, 16 }
  0xc0   :  { %v539_v62 = vcvt.f32.s32 %v536_v58  ;;  %v504_v63 = vpop.xlane.xlu0 %503 }
  0xc1   :  { %v507_v2 = vcvt.f32.s32 %v504_v63 }
  0xc2   :  { %v542_v3 = vadd.s32 %v541_v59, %v539_v62 }
  0xc3   :  { %v510_v4 = vadd.s32 %v509_v0, %v507_v2  ;;  %v600_v56 = vpop.xlane.xlu1 %599 }
  0xc4   :  { %545 = vst [vmem:[%s1056_s2 + $0x2] sm:$0x1] %v542_v3  ;;  %v603_v10 = vcvt.f32.s32 %v600_v56  ;;  %v568_v11 = vpop.xlane.xlu0 %567 }
  0xc5   :  { %513 = vst [vmem:[%s1056_s2 + $0x1] sm:$0x1] %v510_v4  ;;  %v571_v14 = vcvt.f32.s32 %v568_v11 }
  0xc6   :  { %v606_v8 = vadd.s32 %v605_v57, %v603_v10 }
  0xc7   :  { %v574_v9 = vadd.s32 %v573_v12, %v571_v14  ;;  %v664_v15 = vpop.xlane.xlu1 %663 }
  0xc8   :  { %609 = vst [vmem:[%s1056_s2 + $0x4] sm:$0x1] %v606_v8  ;;  %v667_v60 = vcvt.f32.s32 %v664_v15  ;;  %v632_v55 = vpop.xlane.xlu0 %631 }
  0xc9   :  { %577 = vst [vmem:[%s1056_s2 + $0x3] sm:$0x1] %v574_v9  ;;  %v635_v23 = vcvt.f32.s32 %v632_v55 }
  0xca   :  { %v670_v21 = vadd.s32 %v669_v16, %v667_v60 }
  0xcb   :  { %v638_v24 = vadd.s32 %v637_v20, %v635_v23  ;;  %v728_v25 = vpop.xlane.xlu1 %727 }
  0xcc   :  { %673 = vst [vmem:[%s1056_s2 + $0x6] sm:$0x1] %v670_v21  ;;  %v731_v28 = vcvt.f32.s32 %v728_v25  ;;  %v696_v29 = vpop.xlane.xlu0 %695 }
  0xcd   :  { %641 = vst [vmem:[%s1056_s2 + $0x5] sm:$0x1] %v638_v24  ;;  %v699_v30 = vcvt.f32.s32 %v696_v29 }
  0xce   :  { %v734_v31 = vadd.s32 %v733_v19, %v731_v28 }
  0xcf   :  { %v702_v32 = vadd.s32 %v701_v13, %v699_v30  ;;  %v792_v33 = vpop.xlane.xlu1 %791 }
  0xd0   :  { %737 = vst [vmem:[%s1056_s2 + $0x8] sm:$0x1] %v734_v31  ;;  %v795_v34 = vcvt.f32.s32 %v792_v33  ;;  %v760_v35 = vpop.xlane.xlu0 %759 }
  0xd1   :  { %705 = vst [vmem:[%s1056_s2 + $0x7] sm:$0x1] %v702_v32  ;;  %v763_v37 = vcvt.f32.s32 %v760_v35 }
  0xd2   :  { %v798_v38 = vadd.s32 %v797_v5, %v795_v34 }
  0xd3   :  { %v766_v39 = vadd.s32 %v765_v36, %v763_v37  ;;  %v512_v40 = vpop.xlane.xlu1 %511 }
  0xd4   :  { %801 = vst [vmem:[%s1056_s2 + $0xa] sm:$0x1] %v798_v38  ;;  %v480_v41 = vpop.xlane.xlu0 %479  ;;  %514 = vst [vmem:[%s1057_s3 + $0x1] sm:$0x1] %v512_v40 }
  0xd5   :  { %769 = vst [vmem:[%s1056_s2 + $0x9] sm:$0x1] %v766_v39  ;;  %482 = vst [vmem:[%s1057_s3] sm:$0x1] %v480_v41 }
  0xd7   :  { %v576_v42 = vpop.xlane.xlu1 %575 }
  0xd8   :  { %v544_v43 = vpop.xlane.xlu0 %543  ;;  %578 = vst [vmem:[%s1057_s3 + $0x3] sm:$0x1] %v576_v42 }
  0xd9   :  { %546 = vst [vmem:[%s1057_s3 + $0x2] sm:$0x1] %v544_v43 }
  0xdb   :  { %v640_v44 = vpop.xlane.xlu1 %639 }
  0xdc   :  { %v608_v45 = vpop.xlane.xlu0 %607  ;;  %642 = vst [vmem:[%s1057_s3 + $0x5] sm:$0x1] %v640_v44 }
  0xdd   :  { %610 = vst [vmem:[%s1057_s3 + $0x4] sm:$0x1] %v608_v45 }
  0xdf   :  { %v704_v46 = vpop.xlane.xlu1 %703 }
  0xe0   :  { %v672_v47 = vpop.xlane.xlu0 %671  ;;  %706 = vst [vmem:[%s1057_s3 + $0x7] sm:$0x1] %v704_v46 }
  0xe1   :  { %674 = vst [vmem:[%s1057_s3 + $0x6] sm:$0x1] %v672_v47 }
  0xe3   :  { %v768_v48 = vpop.xlane.xlu1 %767 }
  0xe4   :  { %v736_v49 = vpop.xlane.xlu0 %735  ;;  %770 = vst [vmem:[%s1057_s3 + $0x9] sm:$0x1] %v768_v48 }
  0xe5   :  { %738 = vst [vmem:[%s1057_s3 + $0x8] sm:$0x1] %v736_v49 }
  0xe8   :  { %v800_v50 = vpop.xlane.xlu0 %799 }
  0xe9   :  { %802 = vst [vmem:[%s1057_s3 + $0xa] sm:$0x1] %v800_v50 }

</bundles_post_ra>
